<compile_context>
chip_gen: v7x
topology: tpu7x:2x2x1
jax: 0.10.0
libtpu: 0.0.40
codegen_flags: <defaults>
</compile_context>

<pallas_src>
import functools

import jax
import jax.numpy as jnp
from jax.experimental import pallas as pl
from jax.experimental.pallas import tpu as pltpu


_DOT = dict(preferred_element_type=jnp.float32,
            precision=jax.lax.Precision.HIGHEST)


# ----------------------------- kernel helpers -------------------------------

def _shift_lanes(x, off):
    """y[:, p] = x[:, p + off]; zero-filled where p + off is out of range.

    x: (C, P) f32 value, off: static Python int. Built once per conv tap.
    """
    C, P = x.shape
    a = abs(off)
    if a == 0:
        return x
    z = jnp.zeros((C, a), x.dtype)
    if off < 0:
        return jnp.concatenate([z, x], axis=1)[:, :P]
    return jnp.concatenate([x, z], axis=1)[:, a:]


def _conv_h(x, w_ref, dil, W):
    """(3,1) conv along H on flattened (C, H*W); 'same' zero pad=dil, dilation=dil.

    H-shifts are exact multiples of W in the flattened axis, so the zero-fill
    shift alone implements the image-boundary zero padding.
    """
    acc = jnp.dot(w_ref[1], x, **_DOT)
    acc = acc + jnp.dot(w_ref[0], _shift_lanes(x, -dil * W), **_DOT)   # x[h-dil]
    acc = acc + jnp.dot(w_ref[2], _shift_lanes(x, +dil * W), **_DOT)   # x[h+dil]
    return acc


def _conv_w(x, w_ref, dil, col, W):
    """(1,3) conv along W on flattened (C, H*W); 'same' zero pad=dil, dilation=dil.

    Flat shifts by +-dil cross row boundaries, so mask columns w<dil / w>=W-dil.
    """
    x_m = jnp.where(col >= dil, _shift_lanes(x, -dil), 0.0)            # x[h, w-dil]
    x_p = jnp.where(col < W - dil, _shift_lanes(x, +dil), 0.0)         # x[h, w+dil]
    acc = jnp.dot(w_ref[1], x, **_DOT)
    acc = acc + jnp.dot(w_ref[0], x_m, **_DOT)
    acc = acc + jnp.dot(w_ref[2], x_p, **_DOT)
    return acc


# --------------------------------- kernel -----------------------------------

def nb1d_kernel(x_ref,
                wh1_ref, b1_ref, ww1_ref, s1_ref, t1_ref,
                wh2_ref, b3_ref, ww2_ref, s2_ref, t2_ref,
                o_ref, *, C, H, W, dilated):
    P = H * W
    x = x_ref[0].astype(jnp.float32)                       # (C, H*W)
    col = jax.lax.broadcasted_iota(jnp.int32, (C, P), 1) % W  # hoisted w-index

    # conv3x1_1 + bias + relu
    y = _conv_h(x, wh1_ref, 1, W) + b1_ref[...]
    y = jnp.maximum(y, 0.0)
    # conv1x3_1 (bias folded into bn1 shift) + bn1 + relu
    y = _conv_w(y, ww1_ref, 1, col, W)
    y = jnp.maximum(y * s1_ref[...] + t1_ref[...], 0.0)
    # conv3x1_2 (dilated) + bias + relu
    y = _conv_h(y, wh2_ref, dilated, W) + b3_ref[...]
    y = jnp.maximum(y, 0.0)
    # conv1x3_2 (dilated, bias folded into bn2 shift) + bn2
    y = _conv_w(y, ww2_ref, dilated, col, W)
    y = y * s2_ref[...] + t2_ref[...]
    # dropout skipped (p == 0); residual + relu
    o_ref[0] = jnp.maximum(y + x, 0.0).astype(o_ref.dtype)


# -------------------------------- wrapper -----------------------------------

def non_bottleneck_1d_forward(x, w1, b1, w2, b2, g1, be1, m1, v1,
                              w3, b3, w4, b4, g2, be2, m2, v2,
                              dilated, eps=1e-3):
    N, C, H, W = x.shape
    P = H * W
    f32 = jnp.float32

    # Fold eval-mode BN into per-channel scale/shift; fold the bias of the conv
    # feeding each BN into the BN shift.
    s1 = g1 / jnp.sqrt(v1 + eps)
    t1 = (be1 - m1 * s1) + s1 * b2
    s2 = g2 / jnp.sqrt(v2 + eps)
    t2 = (be2 - m2 * s2) + s2 * b4

    # Per-tap (C_out, C_in) weight matrices for the MXU formulation, in VMEM.
    wh1 = jnp.transpose(w1[:, :, :, 0], (2, 0, 1)).astype(f32)   # (3, C, C)
    ww1 = jnp.transpose(w2[:, :, 0, :], (2, 0, 1)).astype(f32)
    wh2 = jnp.transpose(w3[:, :, :, 0], (2, 0, 1)).astype(f32)
    ww2 = jnp.transpose(w4[:, :, 0, :], (2, 0, 1)).astype(f32)

    def col_vec(v):                       # (C,) -> (C, 1) for lane-broadcast
        return v.reshape(C, 1).astype(f32)

    def full_spec(shape):                 # whole small array, resident in VMEM
        return pl.BlockSpec(shape, lambda n: (0,) * len(shape))

    x2 = x.reshape(N, C, P)               # lane-dense spatial layout (free reshape)

    kernel = functools.partial(nb1d_kernel, C=C, H=H, W=W, dilated=dilated)
    out = pl.pallas_call(
        kernel,
        out_shape=jax.ShapeDtypeStruct((N, C, P), x.dtype),
        grid=(N,),
        in_specs=[
            pl.BlockSpec((1, C, P), lambda n: (n, 0, 0)),
            full_spec((3, C, C)), full_spec((C, 1)),
            full_spec((3, C, C)), full_spec((C, 1)), full_spec((C, 1)),
            full_spec((3, C, C)), full_spec((C, 1)),
            full_spec((3, C, C)), full_spec((C, 1)), full_spec((C, 1)),
        ],
        out_specs=pl.BlockSpec((1, C, P), lambda n: (n, 0, 0)),
        compiler_params=pltpu.CompilerParams(dimension_semantics=("parallel",)),
    )(x2,
      wh1, col_vec(b1), ww1, col_vec(s1), col_vec(t1),
      wh2, col_vec(b3), ww2, col_vec(s2), col_vec(t2))
    return out.reshape(N, C, H, W)


# ------------------------- pure-JAX reference (check) ------------------------

def ref_forward(x, w1, b1, w2, b2, g1, be1, m1, v1,
                w3, b3, w4, b4, g2, be2, m2, v2, dilated, eps=1e-3):
    def conv(xx, w, b, pad, dil):
        y = jax.lax.conv_general_dilated(
            xx, w, window_strides=(1, 1), padding=pad, rhs_dilation=dil,
            dimension_numbers=("NCHW", "OIHW", "NCHW"),
            precision=jax.lax.Precision.HIGHEST)
        return y + b[None, :, None, None]

    def bn(xx, g, be, m, v):
        return ((xx - m[None, :, None, None]) /
                jnp.sqrt(v[None, :, None, None] + eps) * g[None, :, None, None]
                + be[None, :, None, None])

    d = dilated
    y = jax.nn.relu(conv(x, w1, b1, ((1, 1), (0, 0)), (1, 1)))
    y = jax.nn.relu(bn(conv(y, w2, b2, ((0, 0), (1, 1)), (1, 1)), g1, be1, m1, v1))
    y = jax.nn.relu(conv(y, w3, b3, ((d, d), (0, 0)), (d, 1)))
    y = bn(conv(y, w4, b4, ((0, 0), (d, d)), (1, d)), g2, be2, m2, v2)
    return jax.nn.relu(y + x)


# ---------------------------------- main -------------------------------------

if __name__ == "__main__":
    key = jax.random.PRNGKey(0)
    N, C, H, W = 2, 4, 16, 16
    dilated = 2
    eps = 1e-3  # PyTorch BatchNorm2d(eps=0.001)

    ks = jax.random.split(key, 17)
    x = jax.random.normal(ks[0], (N, C, H, W), jnp.float32)

    # Conv weights (PyTorch layout: (Cout, Cin, kH, kW)) + biases.
    w1 = 0.3 * jax.random.normal(ks[1], (C, C, 3, 1), jnp.float32)
    b1 = 0.1 * jax.random.normal(ks[2], (C,), jnp.float32)
    w2 = 0.3 * jax.random.normal(ks[3], (C, C, 1, 3), jnp.float32)
    b2 = 0.1 * jax.random.normal(ks[4], (C,), jnp.float32)
    w3 = 0.3 * jax.random.normal(ks[5], (C, C, 3, 1), jnp.float32)
    b3 = 0.1 * jax.random.normal(ks[6], (C,), jnp.float32)
    w4 = 0.3 * jax.random.normal(ks[7], (C, C, 1, 3), jnp.float32)
    b4 = 0.1 * jax.random.normal(ks[8], (C,), jnp.float32)

    # BatchNorm params (gamma, beta, running_mean, running_var), eval mode.
    g1 = 1.0 + 0.1 * jax.random.normal(ks[9], (C,), jnp.float32)
    be1 = 0.1 * jax.random.normal(ks[10], (C,), jnp.float32)
    m1 = 0.1 * jax.random.normal(ks[11], (C,), jnp.float32)
    v1 = 0.5 + jnp.abs(jax.random.normal(ks[12], (C,), jnp.float32))
    g2 = 1.0 + 0.1 * jax.random.normal(ks[13], (C,), jnp.float32)
    be2 = 0.1 * jax.random.normal(ks[14], (C,), jnp.float32)
    m2 = 0.1 * jax.random.normal(ks[15], (C,), jnp.float32)
    v2 = 0.5 + jnp.abs(jax.random.normal(ks[16], (C,), jnp.float32))

    out = non_bottleneck_1d_forward(
        x, w1, b1, w2, b2, g1, be1, m1, v1,
        w3, b3, w4, b4, g2, be2, m2, v2, dilated, eps)
    out = jax.block_until_ready(out)

    ref = ref_forward(x, w1, b1, w2, b2, g1, be1, m1, v1,
                      w3, b3, w4, b4, g2, be2, m2, v2, dilated, eps)
    ref = jax.block_until_ready(ref)

    max_err = float(jnp.max(jnp.abs(out - ref)))
    assert max_err < 2e-3, f"mismatch vs reference, max abs err = {max_err}"
    print("KERNEL_OK")
</pallas_src>

<mosaic_0001>
module attributes {stable_mosaic.version = 11 : i64} {
  func.func @nb1d_kernel(%arg0: i32, %arg1: memref<1x4x256xf32, #tpu.memory_space<vmem>>, %arg2: memref<3x4x4xf32, #tpu.memory_space<vmem>>, %arg3: memref<4x1xf32, #tpu.memory_space<vmem>>, %arg4: memref<3x4x4xf32, #tpu.memory_space<vmem>>, %arg5: memref<4x1xf32, #tpu.memory_space<vmem>>, %arg6: memref<4x1xf32, #tpu.memory_space<vmem>>, %arg7: memref<3x4x4xf32, #tpu.memory_space<vmem>>, %arg8: memref<4x1xf32, #tpu.memory_space<vmem>>, %arg9: memref<3x4x4xf32, #tpu.memory_space<vmem>>, %arg10: memref<4x1xf32, #tpu.memory_space<vmem>>, %arg11: memref<4x1xf32, #tpu.memory_space<vmem>>, %arg12: memref<1x4x256xf32, #tpu.memory_space<vmem>>) attributes {dimension_semantics = [#tpu.dimension_semantics<parallel>], iteration_bounds = array<i64: 2>, scalar_prefetch = 0 : i64, scratch_operands = 0 : i64, tpu.core_type = #tpu.core_type<tc>, window_params = [{transform_indices = @transform_0, window_bounds = array<i64: 1, 4, 256>}, {pipeline_mode = #tpu.pipeline_mode<synchronous>, transform_indices = @transform_1, window_bounds = array<i64: 3, 4, 4>}, {pipeline_mode = #tpu.pipeline_mode<synchronous>, transform_indices = @transform_2, window_bounds = array<i64: 4, 1>}, {pipeline_mode = #tpu.pipeline_mode<synchronous>, transform_indices = @transform_3, window_bounds = array<i64: 3, 4, 4>}, {pipeline_mode = #tpu.pipeline_mode<synchronous>, transform_indices = @transform_4, window_bounds = array<i64: 4, 1>}, {pipeline_mode = #tpu.pipeline_mode<synchronous>, transform_indices = @transform_5, window_bounds = array<i64: 4, 1>}, {pipeline_mode = #tpu.pipeline_mode<synchronous>, transform_indices = @transform_6, window_bounds = array<i64: 3, 4, 4>}, {pipeline_mode = #tpu.pipeline_mode<synchronous>, transform_indices = @transform_7, window_bounds = array<i64: 4, 1>}, {pipeline_mode = #tpu.pipeline_mode<synchronous>, transform_indices = @transform_8, window_bounds = array<i64: 3, 4, 4>}, {pipeline_mode = #tpu.pipeline_mode<synchronous>, transform_indices = @transform_9, window_bounds = array<i64: 4, 1>}, {pipeline_mode = #tpu.pipeline_mode<synchronous>, transform_indices = @transform_10, window_bounds = array<i64: 4, 1>}, {transform_indices = @transform_11, window_bounds = array<i64: 1, 4, 256>}]} {
    %c0 = arith.constant 0 : index
    %c0_0 = arith.constant 0 : index
    %c0_1 = arith.constant 0 : index
    %0 = vector.load %arg1[%c0, %c0_0, %c0_1] : memref<1x4x256xf32, #tpu.memory_space<vmem>>, vector<1x4x256xf32>
    %1 = vector.shape_cast %0 : vector<1x4x256xf32> to vector<4x256xf32>
    %2 = tpu.iota {dimensions = array<i32: 1>} : vector<4x256xi32>
    %c16_i32 = arith.constant 16 : i32
    %c0_i32 = arith.constant 0 : i32
    %3 = arith.cmpi eq, %c16_i32, %c0_i32 : i32
    %c1_i32 = arith.constant 1 : i32
    %4 = arith.select %3, %c1_i32, %c16_i32 : i32
    %5 = vector.broadcast %4 : i32 to vector<4x256xi32>
    %6 = arith.remsi %2, %5 : vector<4x256xi32>
    %c0_i32_2 = arith.constant 0 : i32
    %7 = vector.broadcast %c0_i32_2 : i32 to vector<4x256xi32>
    %8 = arith.cmpi ne, %6, %7 : vector<4x256xi32>
    %c0_i32_3 = arith.constant 0 : i32
    %9 = vector.broadcast %c0_i32_3 : i32 to vector<4x256xi32>
    %10 = arith.cmpi slt, %6, %9 : vector<4x256xi32>
    %c0_i32_4 = arith.constant 0 : i32
    %11 = arith.cmpi slt, %4, %c0_i32_4 : i32
    %12 = vector.broadcast %11 : i1 to vector<4x256xi1>
    %13 = vector.broadcast %12 : vector<4x256xi1> to vector<4x256xi1>
    %14 = arith.xori %10, %13 : vector<4x256xi1>
    %15 = arith.andi %14, %8 : vector<4x256xi1>
    %16 = vector.broadcast %4 : i32 to vector<4x256xi32>
    %17 = arith.addi %6, %16 : vector<4x256xi32>
    %18 = arith.select %15, %17, %6 : vector<4x256xi1>, vector<4x256xi32>
    %c1 = arith.constant 1 : index
    %c0_5 = arith.constant 0 : index
    %c0_6 = arith.constant 0 : index
    %19 = vector.load %arg2[%c1, %c0_5, %c0_6] : memref<3x4x4xf32, #tpu.memory_space<vmem>>, vector<1x4x4xf32>
    %20 = vector.shape_cast %19 : vector<1x4x4xf32> to vector<4x4xf32>
    %cst = arith.constant dense<0.000000e+00> : vector<4x256xf32>
    %21 = tpu.matmul %20, %1, %cst {dimension_numbers = #tpu.dot_dimension_numbers<[1], [0], [0], [1], [0, 0, 1, 1], [], []>, precision = #tpu.contract_precision<fp32>} : vector<4x4xf32>, vector<4x256xf32>, vector<4x256xf32> -> vector<4x256xf32>
    %c0_7 = arith.constant 0 : index
    %c0_8 = arith.constant 0 : index
    %c0_9 = arith.constant 0 : index
    %22 = vector.load %arg2[%c0_7, %c0_8, %c0_9] : memref<3x4x4xf32, #tpu.memory_space<vmem>>, vector<1x4x4xf32>
    %23 = vector.shape_cast %22 : vector<1x4x4xf32> to vector<4x4xf32>
    %cst_10 = arith.constant 0.000000e+00 : f32
    %24 = vector.broadcast %cst_10 : f32 to vector<4x16xf32>
    %25 = tpu.concatenate %24, %1 in 1 : vector<4x16xf32>, vector<4x256xf32> -> vector<4x272xf32>
    %26 = vector.extract_strided_slice %25 {offsets = [0, 0], sizes = [4, 256], strides = [1, 1]} : vector<4x272xf32> to vector<4x256xf32>
    %cst_11 = arith.constant dense<0.000000e+00> : vector<4x256xf32>
    %27 = tpu.matmul %23, %26, %cst_11 {dimension_numbers = #tpu.dot_dimension_numbers<[1], [0], [0], [1], [0, 0, 1, 1], [], []>, precision = #tpu.contract_precision<fp32>} : vector<4x4xf32>, vector<4x256xf32>, vector<4x256xf32> -> vector<4x256xf32>
    %28 = arith.addf %21, %27 : vector<4x256xf32>
    %c2 = arith.constant 2 : index
    %c0_12 = arith.constant 0 : index
    %c0_13 = arith.constant 0 : index
    %29 = vector.load %arg2[%c2, %c0_12, %c0_13] : memref<3x4x4xf32, #tpu.memory_space<vmem>>, vector<1x4x4xf32>
    %30 = vector.shape_cast %29 : vector<1x4x4xf32> to vector<4x4xf32>
    %cst_14 = arith.constant 0.000000e+00 : f32
    %31 = vector.broadcast %cst_14 : f32 to vector<4x16xf32>
    %32 = tpu.concatenate %1, %31 in 1 : vector<4x256xf32>, vector<4x16xf32> -> vector<4x272xf32>
    %33 = vector.extract_strided_slice %32 {offsets = [0, 16], sizes = [4, 256], strides = [1, 1]} : vector<4x272xf32> to vector<4x256xf32>
    %cst_15 = arith.constant dense<0.000000e+00> : vector<4x256xf32>
    %34 = tpu.matmul %30, %33, %cst_15 {dimension_numbers = #tpu.dot_dimension_numbers<[1], [0], [0], [1], [0, 0, 1, 1], [], []>, precision = #tpu.contract_precision<fp32>} : vector<4x4xf32>, vector<4x256xf32>, vector<4x256xf32> -> vector<4x256xf32>
    %35 = arith.addf %28, %34 : vector<4x256xf32>
    %c0_16 = arith.constant 0 : index
    %c0_17 = arith.constant 0 : index
    %36 = vector.load %arg3[%c0_16, %c0_17] : memref<4x1xf32, #tpu.memory_space<vmem>>, vector<4x1xf32>
    %37 = vector.broadcast %36 : vector<4x1xf32> to vector<4x256xf32>
    %38 = arith.addf %35, %37 : vector<4x256xf32>
    %cst_18 = arith.constant 0.000000e+00 : f32
    %39 = vector.broadcast %cst_18 : f32 to vector<4x256xf32>
    %40 = arith.maximumf %38, %39 : vector<4x256xf32>
    %c1_i32_19 = arith.constant 1 : i32
    %41 = vector.broadcast %c1_i32_19 : i32 to vector<4x256xi32>
    %42 = arith.cmpi sge, %18, %41 : vector<4x256xi32>
    %cst_20 = arith.constant 0.000000e+00 : f32
    %43 = vector.broadcast %cst_20 : f32 to vector<4x1xf32>
    %44 = tpu.concatenate %43, %40 in 1 : vector<4x1xf32>, vector<4x256xf32> -> vector<4x257xf32>
    %45 = vector.extract_strided_slice %44 {offsets = [0, 0], sizes = [4, 256], strides = [1, 1]} : vector<4x257xf32> to vector<4x256xf32>
    %cst_21 = arith.constant 0.000000e+00 : f32
    %46 = vector.broadcast %cst_21 : f32 to vector<4x256xf32>
    %47 = arith.select %42, %45, %46 : vector<4x256xi1>, vector<4x256xf32>
    %c15_i32 = arith.constant 15 : i32
    %48 = vector.broadcast %c15_i32 : i32 to vector<4x256xi32>
    %49 = arith.cmpi slt, %18, %48 : vector<4x256xi32>
    %cst_22 = arith.constant 0.000000e+00 : f32
    %50 = vector.broadcast %cst_22 : f32 to vector<4x1xf32>
    %51 = tpu.concatenate %40, %50 in 1 : vector<4x256xf32>, vector<4x1xf32> -> vector<4x257xf32>
    %52 = vector.extract_strided_slice %51 {offsets = [0, 1], sizes = [4, 256], strides = [1, 1]} : vector<4x257xf32> to vector<4x256xf32>
    %cst_23 = arith.constant 0.000000e+00 : f32
    %53 = vector.broadcast %cst_23 : f32 to vector<4x256xf32>
    %54 = arith.select %49, %52, %53 : vector<4x256xi1>, vector<4x256xf32>
    %c1_24 = arith.constant 1 : index
    %c0_25 = arith.constant 0 : index
    %c0_26 = arith.constant 0 : index
    %55 = vector.load %arg4[%c1_24, %c0_25, %c0_26] : memref<3x4x4xf32, #tpu.memory_space<vmem>>, vector<1x4x4xf32>
    %56 = vector.shape_cast %55 : vector<1x4x4xf32> to vector<4x4xf32>
    %cst_27 = arith.constant dense<0.000000e+00> : vector<4x256xf32>
    %57 = tpu.matmul %56, %40, %cst_27 {dimension_numbers = #tpu.dot_dimension_numbers<[1], [0], [0], [1], [0, 0, 1, 1], [], []>, precision = #tpu.contract_precision<fp32>} : vector<4x4xf32>, vector<4x256xf32>, vector<4x256xf32> -> vector<4x256xf32>
    %c0_28 = arith.constant 0 : index
    %c0_29 = arith.constant 0 : index
    %c0_30 = arith.constant 0 : index
    %58 = vector.load %arg4[%c0_28, %c0_29, %c0_30] : memref<3x4x4xf32, #tpu.memory_space<vmem>>, vector<1x4x4xf32>
    %59 = vector.shape_cast %58 : vector<1x4x4xf32> to vector<4x4xf32>
    %cst_31 = arith.constant dense<0.000000e+00> : vector<4x256xf32>
    %60 = tpu.matmul %59, %47, %cst_31 {dimension_numbers = #tpu.dot_dimension_numbers<[1], [0], [0], [1], [0, 0, 1, 1], [], []>, precision = #tpu.contract_precision<fp32>} : vector<4x4xf32>, vector<4x256xf32>, vector<4x256xf32> -> vector<4x256xf32>
    %61 = arith.addf %57, %60 : vector<4x256xf32>
    %c2_32 = arith.constant 2 : index
    %c0_33 = arith.constant 0 : index
    %c0_34 = arith.constant 0 : index
    %62 = vector.load %arg4[%c2_32, %c0_33, %c0_34] : memref<3x4x4xf32, #tpu.memory_space<vmem>>, vector<1x4x4xf32>
    %63 = vector.shape_cast %62 : vector<1x4x4xf32> to vector<4x4xf32>
    %cst_35 = arith.constant dense<0.000000e+00> : vector<4x256xf32>
    %64 = tpu.matmul %63, %54, %cst_35 {dimension_numbers = #tpu.dot_dimension_numbers<[1], [0], [0], [1], [0, 0, 1, 1], [], []>, precision = #tpu.contract_precision<fp32>} : vector<4x4xf32>, vector<4x256xf32>, vector<4x256xf32> -> vector<4x256xf32>
    %65 = arith.addf %61, %64 : vector<4x256xf32>
    %c0_36 = arith.constant 0 : index
    %c0_37 = arith.constant 0 : index
    %66 = vector.load %arg5[%c0_36, %c0_37] : memref<4x1xf32, #tpu.memory_space<vmem>>, vector<4x1xf32>
    %67 = vector.broadcast %66 : vector<4x1xf32> to vector<4x256xf32>
    %68 = arith.mulf %65, %67 : vector<4x256xf32>
    %c0_38 = arith.constant 0 : index
    %c0_39 = arith.constant 0 : index
    %69 = vector.load %arg6[%c0_38, %c0_39] : memref<4x1xf32, #tpu.memory_space<vmem>>, vector<4x1xf32>
    %70 = vector.broadcast %69 : vector<4x1xf32> to vector<4x256xf32>
    %71 = arith.addf %68, %70 : vector<4x256xf32>
    %cst_40 = arith.constant 0.000000e+00 : f32
    %72 = vector.broadcast %cst_40 : f32 to vector<4x256xf32>
    %73 = arith.maximumf %71, %72 : vector<4x256xf32>
    %c1_41 = arith.constant 1 : index
    %c0_42 = arith.constant 0 : index
    %c0_43 = arith.constant 0 : index
    %74 = vector.load %arg7[%c1_41, %c0_42, %c0_43] : memref<3x4x4xf32, #tpu.memory_space<vmem>>, vector<1x4x4xf32>
    %75 = vector.shape_cast %74 : vector<1x4x4xf32> to vector<4x4xf32>
    %cst_44 = arith.constant dense<0.000000e+00> : vector<4x256xf32>
    %76 = tpu.matmul %75, %73, %cst_44 {dimension_numbers = #tpu.dot_dimension_numbers<[1], [0], [0], [1], [0, 0, 1, 1], [], []>, precision = #tpu.contract_precision<fp32>} : vector<4x4xf32>, vector<4x256xf32>, vector<4x256xf32> -> vector<4x256xf32>
    %c0_45 = arith.constant 0 : index
    %c0_46 = arith.constant 0 : index
    %c0_47 = arith.constant 0 : index
    %77 = vector.load %arg7[%c0_45, %c0_46, %c0_47] : memref<3x4x4xf32, #tpu.memory_space<vmem>>, vector<1x4x4xf32>
    %78 = vector.shape_cast %77 : vector<1x4x4xf32> to vector<4x4xf32>
    %cst_48 = arith.constant 0.000000e+00 : f32
    %79 = vector.broadcast %cst_48 : f32 to vector<4x32xf32>
    %80 = tpu.concatenate %79, %73 in 1 : vector<4x32xf32>, vector<4x256xf32> -> vector<4x288xf32>
    %81 = vector.extract_strided_slice %80 {offsets = [0, 0], sizes = [4, 256], strides = [1, 1]} : vector<4x288xf32> to vector<4x256xf32>
    %cst_49 = arith.constant dense<0.000000e+00> : vector<4x256xf32>
    %82 = tpu.matmul %78, %81, %cst_49 {dimension_numbers = #tpu.dot_dimension_numbers<[1], [0], [0], [1], [0, 0, 1, 1], [], []>, precision = #tpu.contract_precision<fp32>} : vector<4x4xf32>, vector<4x256xf32>, vector<4x256xf32> -> vector<4x256xf32>
    %83 = arith.addf %76, %82 : vector<4x256xf32>
    %c2_50 = arith.constant 2 : index
    %c0_51 = arith.constant 0 : index
    %c0_52 = arith.constant 0 : index
    %84 = vector.load %arg7[%c2_50, %c0_51, %c0_52] : memref<3x4x4xf32, #tpu.memory_space<vmem>>, vector<1x4x4xf32>
    %85 = vector.shape_cast %84 : vector<1x4x4xf32> to vector<4x4xf32>
    %cst_53 = arith.constant 0.000000e+00 : f32
    %86 = vector.broadcast %cst_53 : f32 to vector<4x32xf32>
    %87 = tpu.concatenate %73, %86 in 1 : vector<4x256xf32>, vector<4x32xf32> -> vector<4x288xf32>
    %88 = vector.extract_strided_slice %87 {offsets = [0, 32], sizes = [4, 256], strides = [1, 1]} : vector<4x288xf32> to vector<4x256xf32>
    %cst_54 = arith.constant dense<0.000000e+00> : vector<4x256xf32>
    %89 = tpu.matmul %85, %88, %cst_54 {dimension_numbers = #tpu.dot_dimension_numbers<[1], [0], [0], [1], [0, 0, 1, 1], [], []>, precision = #tpu.contract_precision<fp32>} : vector<4x4xf32>, vector<4x256xf32>, vector<4x256xf32> -> vector<4x256xf32>
    %90 = arith.addf %83, %89 : vector<4x256xf32>
    %c0_55 = arith.constant 0 : index
    %c0_56 = arith.constant 0 : index
    %91 = vector.load %arg8[%c0_55, %c0_56] : memref<4x1xf32, #tpu.memory_space<vmem>>, vector<4x1xf32>
    %92 = vector.broadcast %91 : vector<4x1xf32> to vector<4x256xf32>
    %93 = arith.addf %90, %92 : vector<4x256xf32>
    %cst_57 = arith.constant 0.000000e+00 : f32
    %94 = vector.broadcast %cst_57 : f32 to vector<4x256xf32>
    %95 = arith.maximumf %93, %94 : vector<4x256xf32>
    %c2_i32 = arith.constant 2 : i32
    %96 = vector.broadcast %c2_i32 : i32 to vector<4x256xi32>
    %97 = arith.cmpi sge, %18, %96 : vector<4x256xi32>
    %cst_58 = arith.constant 0.000000e+00 : f32
    %98 = vector.broadcast %cst_58 : f32 to vector<4x2xf32>
    %99 = tpu.concatenate %98, %95 in 1 : vector<4x2xf32>, vector<4x256xf32> -> vector<4x258xf32>
    %100 = vector.extract_strided_slice %99 {offsets = [0, 0], sizes = [4, 256], strides = [1, 1]} : vector<4x258xf32> to vector<4x256xf32>
    %cst_59 = arith.constant 0.000000e+00 : f32
    %101 = vector.broadcast %cst_59 : f32 to vector<4x256xf32>
    %102 = arith.select %97, %100, %101 : vector<4x256xi1>, vector<4x256xf32>
    %c14_i32 = arith.constant 14 : i32
    %103 = vector.broadcast %c14_i32 : i32 to vector<4x256xi32>
    %104 = arith.cmpi slt, %18, %103 : vector<4x256xi32>
    %cst_60 = arith.constant 0.000000e+00 : f32
    %105 = vector.broadcast %cst_60 : f32 to vector<4x2xf32>
    %106 = tpu.concatenate %95, %105 in 1 : vector<4x256xf32>, vector<4x2xf32> -> vector<4x258xf32>
    %107 = vector.extract_strided_slice %106 {offsets = [0, 2], sizes = [4, 256], strides = [1, 1]} : vector<4x258xf32> to vector<4x256xf32>
    %cst_61 = arith.constant 0.000000e+00 : f32
    %108 = vector.broadcast %cst_61 : f32 to vector<4x256xf32>
    %109 = arith.select %104, %107, %108 : vector<4x256xi1>, vector<4x256xf32>
    %c1_62 = arith.constant 1 : index
    %c0_63 = arith.constant 0 : index
    %c0_64 = arith.constant 0 : index
    %110 = vector.load %arg9[%c1_62, %c0_63, %c0_64] : memref<3x4x4xf32, #tpu.memory_space<vmem>>, vector<1x4x4xf32>
    %111 = vector.shape_cast %110 : vector<1x4x4xf32> to vector<4x4xf32>
    %cst_65 = arith.constant dense<0.000000e+00> : vector<4x256xf32>
    %112 = tpu.matmul %111, %95, %cst_65 {dimension_numbers = #tpu.dot_dimension_numbers<[1], [0], [0], [1], [0, 0, 1, 1], [], []>, precision = #tpu.contract_precision<fp32>} : vector<4x4xf32>, vector<4x256xf32>, vector<4x256xf32> -> vector<4x256xf32>
    %c0_66 = arith.constant 0 : index
    %c0_67 = arith.constant 0 : index
    %c0_68 = arith.constant 0 : index
    %113 = vector.load %arg9[%c0_66, %c0_67, %c0_68] : memref<3x4x4xf32, #tpu.memory_space<vmem>>, vector<1x4x4xf32>
    %114 = vector.shape_cast %113 : vector<1x4x4xf32> to vector<4x4xf32>
    %cst_69 = arith.constant dense<0.000000e+00> : vector<4x256xf32>
    %115 = tpu.matmul %114, %102, %cst_69 {dimension_numbers = #tpu.dot_dimension_numbers<[1], [0], [0], [1], [0, 0, 1, 1], [], []>, precision = #tpu.contract_precision<fp32>} : vector<4x4xf32>, vector<4x256xf32>, vector<4x256xf32> -> vector<4x256xf32>
    %116 = arith.addf %112, %115 : vector<4x256xf32>
    %c2_70 = arith.constant 2 : index
    %c0_71 = arith.constant 0 : index
    %c0_72 = arith.constant 0 : index
    %117 = vector.load %arg9[%c2_70, %c0_71, %c0_72] : memref<3x4x4xf32, #tpu.memory_space<vmem>>, vector<1x4x4xf32>
    %118 = vector.shape_cast %117 : vector<1x4x4xf32> to vector<4x4xf32>
    %cst_73 = arith.constant dense<0.000000e+00> : vector<4x256xf32>
    %119 = tpu.matmul %118, %109, %cst_73 {dimension_numbers = #tpu.dot_dimension_numbers<[1], [0], [0], [1], [0, 0, 1, 1], [], []>, precision = #tpu.contract_precision<fp32>} : vector<4x4xf32>, vector<4x256xf32>, vector<4x256xf32> -> vector<4x256xf32>
    %120 = arith.addf %116, %119 : vector<4x256xf32>
    %c0_74 = arith.constant 0 : index
    %c0_75 = arith.constant 0 : index
    %121 = vector.load %arg10[%c0_74, %c0_75] : memref<4x1xf32, #tpu.memory_space<vmem>>, vector<4x1xf32>
    %122 = vector.broadcast %121 : vector<4x1xf32> to vector<4x256xf32>
    %123 = arith.mulf %120, %122 : vector<4x256xf32>
    %c0_76 = arith.constant 0 : index
    %c0_77 = arith.constant 0 : index
    %124 = vector.load %arg11[%c0_76, %c0_77] : memref<4x1xf32, #tpu.memory_space<vmem>>, vector<4x1xf32>
    %125 = vector.broadcast %124 : vector<4x1xf32> to vector<4x256xf32>
    %126 = arith.addf %123, %125 : vector<4x256xf32>
    %127 = arith.addf %126, %1 : vector<4x256xf32>
    %cst_78 = arith.constant 0.000000e+00 : f32
    %128 = vector.broadcast %cst_78 : f32 to vector<4x256xf32>
    %129 = arith.maximumf %127, %128 : vector<4x256xf32>
    %c0_79 = arith.constant 0 : index
    %c0_80 = arith.constant 0 : index
    %c0_81 = arith.constant 0 : index
    %130 = vector.load %arg12[%c0_79, %c0_80, %c0_81] : memref<1x4x256xf32, #tpu.memory_space<vmem>>, vector<1x4x256xf32>
    %131 = vector.shape_cast %130 : vector<1x4x256xf32> to vector<4x256xf32>
    %132 = vector.shape_cast %129 : vector<4x256xf32> to vector<1x4x256xf32>
    tpu.vector_store %arg12[%c0_79, %c0_80, %c0_81], %132 {strides = array<i32>} : memref<1x4x256xf32, #tpu.memory_space<vmem>>, vector<1x4x256xf32>,
    return
  }
  func.func @transform_0(%arg0: i32) -> (i32, i32, i32) {
    %c0_i32 = arith.constant 0 : i32
    %c0_i32_0 = arith.constant 0 : i32
    %c0_i32_1 = arith.constant 0 : i32
    return %arg0, %c0_i32, %c0_i32_0 : i32, i32, i32
  }
  func.func @transform_1(%arg0: i32) -> (i32, i32, i32) {
    %c0_i32 = arith.constant 0 : i32
    %c0_i32_0 = arith.constant 0 : i32
    %c0_i32_1 = arith.constant 0 : i32
    %c0_i32_2 = arith.constant 0 : i32
    return %c0_i32, %c0_i32_0, %c0_i32_1 : i32, i32, i32
  }
  func.func @transform_2(%arg0: i32) -> (i32, i32) {
    %c0_i32 = arith.constant 0 : i32
    %c0_i32_0 = arith.constant 0 : i32
    %c0_i32_1 = arith.constant 0 : i32
    return %c0_i32, %c0_i32_0 : i32, i32
  }
  func.func @transform_3(%arg0: i32) -> (i32, i32, i32) {
    %c0_i32 = arith.constant 0 : i32
    %c0_i32_0 = arith.constant 0 : i32
    %c0_i32_1 = arith.constant 0 : i32
    %c0_i32_2 = arith.constant 0 : i32
    return %c0_i32, %c0_i32_0, %c0_i32_1 : i32, i32, i32
  }
  func.func @transform_4(%arg0: i32) -> (i32, i32) {
    %c0_i32 = arith.constant 0 : i32
    %c0_i32_0 = arith.constant 0 : i32
    %c0_i32_1 = arith.constant 0 : i32
    return %c0_i32, %c0_i32_0 : i32, i32
  }
  func.func @transform_5(%arg0: i32) -> (i32, i32) {
    %c0_i32 = arith.constant 0 : i32
    %c0_i32_0 = arith.constant 0 : i32
    %c0_i32_1 = arith.constant 0 : i32
    return %c0_i32, %c0_i32_0 : i32, i32
  }
  func.func @transform_6(%arg0: i32) -> (i32, i32, i32) {
    %c0_i32 = arith.constant 0 : i32
    %c0_i32_0 = arith.constant 0 : i32
    %c0_i32_1 = arith.constant 0 : i32
    %c0_i32_2 = arith.constant 0 : i32
    return %c0_i32, %c0_i32_0, %c0_i32_1 : i32, i32, i32
  }
  func.func @transform_7(%arg0: i32) -> (i32, i32) {
    %c0_i32 = arith.constant 0 : i32
    %c0_i32_0 = arith.constant 0 : i32
    %c0_i32_1 = arith.constant 0 : i32
    return %c0_i32, %c0_i32_0 : i32, i32
  }
  func.func @transform_8(%arg0: i32) -> (i32, i32, i32) {
    %c0_i32 = arith.constant 0 : i32
    %c0_i32_0 = arith.constant 0 : i32
    %c0_i32_1 = arith.constant 0 : i32
    %c0_i32_2 = arith.constant 0 : i32
    return %c0_i32, %c0_i32_0, %c0_i32_1 : i32, i32, i32
  }
  func.func @transform_9(%arg0: i32) -> (i32, i32) {
    %c0_i32 = arith.constant 0 : i32
    %c0_i32_0 = arith.constant 0 : i32
    %c0_i32_1 = arith.constant 0 : i32
    return %c0_i32, %c0_i32_0 : i32, i32
  }
  func.func @transform_10(%arg0: i32) -> (i32, i32) {
    %c0_i32 = arith.constant 0 : i32
    %c0_i32_0 = arith.constant 0 : i32
    %c0_i32_1 = arith.constant 0 : i32
    return %c0_i32, %c0_i32_0 : i32, i32
  }
  func.func @transform_11(%arg0: i32) -> (i32, i32, i32) {
    %c0_i32 = arith.constant 0 : i32
    %c0_i32_0 = arith.constant 0 : i32
    %c0_i32_1 = arith.constant 0 : i32
    return %arg0, %c0_i32, %c0_i32_0 : i32, i32, i32
  }
}

</mosaic_0001>

<bundles_post_ra>
// kernel: tpu_custom_call.1
= control target key start
LH: loop header
LB: loop body
LE: loop exit
PB: predicated region body
PF: predicated region fallthrough
CT: control target
= control target key end

     0   :  { %16 = vsyncpa [#allocation3], 0  ;;  %s7130_s0 = inlined_call_operand.vmem [shape: f32[2,4,256], index: 0, kind: input, shape index: {}]   ;;  %s7131_s1 = inlined_call_operand.vmem [shape: f32[3,4,4], index: 1, kind: input, shape index: {}]   ;;  %s7132_s2 = inlined_call_operand.vmem [shape: f32[4,1], index: 2, kind: input, shape index: {}]   ;;  %s7133_s3 = inlined_call_operand.vmem [shape: f32[3,4,4], index: 3, kind: input, shape index: {}]   ;;  %s7134_s4 = inlined_call_operand.vmem [shape: f32[4,1], index: 4, kind: input, shape index: {}]   ;;  %s7135_s5 = inlined_call_operand.vmem [shape: f32[4,1], index: 5, kind: input, shape index: {}]   ;;  %s7136_s6 = inlined_call_operand.vmem [shape: f32[3,4,4], index: 6, kind: input, shape index: {}]   ;;  %s7137_s7 = inlined_call_operand.vmem [shape: f32[4,1], index: 7, kind: input, shape index: {}]   ;;  %s7138_s8 = inlined_call_operand.hbm [shape: f32[3,4,4], index: 8, kind: input, shape index: {}]   ;;  %s7139_s9 = inlined_call_operand.vmem [shape: f32[4,1], index: 9, kind: input, shape index: {}]   ;;  %s7140_s10 = inlined_call_operand.vmem [shape: f32[4,1], index: 10, kind: input, shape index: {}]   ;;  %s7141_s11 = inlined_call_operand.hbm [shape: f32[2,4,256], index: 11, kind: output, shape index: {}]  }
   0x1   :  { %17 = vsyncpa [#allocation4], 0 }
   0x2   :  { %19 = vsyncpa [#allocation4 + $0x1], 0  ;;  %s6775_s17 = smov 0   ;;  %s6777_s18 = smov 0  }
   0x3   :  { %s6779_s19 = smov 0   ;;  %s6781_s20 = smov 0  }
   0x4 LB: > { %s6796_s21 = sadd.s32 4294967295, %s6699_s20   ;;  %s6381_s22 = sadd.s32 4294967294, %s6699_s20   ;;  %s6699_s20 = sphi %s6781_s20, %s7159_s20   ;;  %s6695_s19 = sphi %s6779_s19, %s7158_s19   ;;  %s6691_s18 = sphi %s6777_s18, %s7157_s18   ;;  %s6687_s17 = sphi %s6775_s17, %s7156_s17  }
   0x5   : > { %s6800_s23 = sadd.s32 1, %s6699_s20   ;;  %s268_s24 = sadd.s32 1, %s6695_s19 }
   0x6   : > { %s265_s25 = ssub.s32 %s6699_s20, %s6800_s23  ;;  %p278_p0 = scmp.ne.s32.totalorder %s6695_s19, %s6691_s18 }
   0x7   : > { %p266_p1 = scmp.eq.s32.totalorder %s265_s25, 0  ;;  %p279_p2 = scmp.eq.s32.totalorder %s6796_s21, 1 }
   0x8   : > { %p284_p3 = scmp.ne.s32.totalorder %s6691_s18, %s6687_s17  ;;  %p285_p4 = scmp.eq.s32.totalorder %s6381_s22, 1 }
   0x9   : > { %s6811_s26 = scalar_select %p266_p1, %s6695_s19, %s268_s24  }
   0xa   : > { %p6813_p5 = por %p279_p2, %p278_p0  ;;  %p6817_p6 = por %p285_p4, %p284_p3 }
   0xb   : > { %7145 = sst [smem:[#allocation8_spill]] %s6811_s26  ;;  %p6382_p7 = scmp.ge.s32.totalorder %s6699_s20, 1 }
   0xc   : > { %s7146_s27 = scalar_select %p6813_p5, 1, 0 }
   0xd   : > { %s7147_s28 = scalar_select %p6817_p6, 1, 0 }
   0xe   : > { %p292_p8 = scmp.lt.s32.totalorder %s6699_s20, 3  ;;  %p7142_p9 = scmp.eq.s32.totalorder %s6796_s21, 0 }
   0xf   : > { %s6701_s30 = smov [#allocation2]   ;;  %s6605_s16 = scalar_lea.hbm %s7138_s8, 192 }
  0x10   : > { %p6824_p10 = pnand %p6382_p7, %p292_p8  ;;  %s325_s12 = sshll.u32 %s6701_s30, 4  ;;  %s326_s12 = int_to_ptr.vmem [resolvable:$true] %s325_s12 }
  0x11   : > { %p6606_p13 = scmp.ne.s32.totalorder %s7138_s8, %s6605_s16  ;;  %p6612_p3 = scmp.lt.u32.totalorder %s6605_s16, %s7138_s8 }
  0x12   : > { %s7148_s29 = scalar_select %p6824_p10, 1, 0 }
  0x13   : > { %p6545_p11 = pneg %p6824_p10 }
  0x15   : > { %p6832_p12 = pnand %p7142_p9, %p6545_p11 }
  0x17   : > { %p6607_p0 = pneg %p6832_p12 }
  0x19   : > { %p6608_p1 = pnand %p6607_p0, %p6606_p13 }
  0x1b   : > { %p6609_p2 = pneg %p6608_p1 }
  0x1d   : > { %p6614_p4 = pnand %p6612_p3, %p6609_p2 }
  0x1f   : > { %6617 = shalt.err (!%p6614_p4)
}
  0x20   : > { %s6618_s26 = scalar_lea.vmem %s326_s12, 192  ;;  %p6626_p9 = scmp.lt.s32.totalorder %s326_s12, %s326_s12 }
  0x21   : > { %p6619_p7 = scmp.ne.s32.totalorder %s326_s12, %s6618_s26  ;;  %p6627_p6 = scmp.lt.s32.totalorder %s6618_s26, %s6618_s26 }
  0x23   : > { %p6621_p8 = pnand %p6619_p7, %p6607_p0  ;;  %p6628_p5 = por %p6627_p6, %p6626_p9 }
  0x25   : > { %p6622_p11 = pneg %p6621_p8 }
  0x27   : > { %p6629_p10 = pnand %p6628_p5, %p6622_p11 }
  0x29   : > { %6632 = shalt.err (!%p6629_p10)
}
  0x2a   : > { %s6702_s14 = smov 64   ;;  %s6703_s15 = smov 4  }
  0x2b   : > { %6548 = dma.hbm_to_vmem [thread:$0]  (!%p6832_p12), %s7138_s8, 192, %s326_s12, [#allocation3], %s6702_s14, %s6702_s14, %s6703_s15  }
  0x2c   : > { %p7150_p13 = scmp.ne.s32.totalorder %s7148_s29, 0 }
  0x2d   : > { %p7151_p1 = scmp.eq.s32.totalorder (!%p7150_p13), %s6796_s21, 0 }
  0x2e   : > { %355 = sbr.rel (%p7150_p13) target bundleno = 1988 (0x7c4), region = 64 }
  0x35   : > { %6678 = dma.done.wait (%p7151_p1), [#allocation3], 192   ;;  %p7152_p0 = pmov %p7151_p1 }
  0x36   : > { %p395_p5 = scmp.lt.s32.totalorder %s6796_s21, 1  ;;  %v6704_v0 = vmov 0.0   ;;  %s6705_s25 = smov 16   ;;  %v430_v3 = vld [vmem:[%s7131_s1] sm:$0xf]  ;;  %vm441_vm0 = vcmask 31744  }
  0x37   : > { %6680 = vsyncadd (%p7152_p0), [#allocation3], 4294967104  ;;  %517 = vmatprep.mubr.f32.mxu0 %v6704_v0  ;;  %1992 = vmatprep.mubr.f32.mxu1 %v6704_v0  ;;  %s6706_s30 = smov 112   ;;  %v443_v4 = vsel %vm441_vm0, %v430_v3, 0  ;;  %vm437_vm1 = vcmask 130048   ;;  %vm445_vm2 = vcmask 1043456  }
  0x38   : > { %s396_s26 = scalar_select %p395_p5, %s6796_s21, 1  ;;  %v6883_v5 = vand.u32 4294901760, %v443_v4  ;;  %v1874_v26 = vld [vmem:[%s7132_s2] sm:$0xf]  ;;  %v6707_v27 = vmov 0   ;;  %vm1397_vm3 = vcmask 916480  }
  0x39   : > { %6601 = vset.pattern.permute.xlu1 %v6707_v27  ;;  %6602 = vset.pattern.permute.xlu0 %v6707_v27  ;;  %v6390_v30 = vld [vmem:[%s7131_s1 + $0x4] sm:$0xf]  ;;  %v6391_v53 = vld [vmem:[%s7131_s1 + $0x8] sm:$0xf]  ;;  %vm1892_vm4 = vcmask 7168   ;;  %vm1907_vm7 = vcmask 1039360  }
  0x3a   : > { %s6401_s13 = sshll.u32 %s396_s26, 3  ;;  %v519_v6 = vsub.f32 %v443_v4, %v6883_v5  ;;  %v917_v31 = vsel %vm441_vm0, %v6390_v30, 0  ;;  %v1401_v55 = vsel %vm441_vm0, %v6391_v53, 0  ;;  %s6710_s14 = smov 32   ;;  %vm3368_vm10 = vcmask 261120  }
  0x3b   : > { %s6865_s29 = scalar_lea.vmem %s7130_s0, %s6401_s13  ;;  %v990_v34 = vand.u32 4294901760, %v917_v31  ;;  %v1474_v58 = vand.u32 4294901760, %v1401_v55  ;;  %s6711_s15 = smov 96   ;;  %vm4325_vm11 = vcmask 785408   ;;  %vm4820_vm12 = vcmask 15360  }
  0x3c   : > { %v6868_v1 = vld [vmem:[%s6865_s29] sm:$0xff]  ;;  %v520_v7 = vand.u32 4294901760, %v519_v6  ;;  %vm4835_vm15 = vcmask 1031168   ;;  %s392_s12 = sand.u32 1, %s6691_s18   ;;  %p7153_p9 = scmp.ne.s32.totalorder %s7146_s27, 0 }
  0x3d   : > { %433 = vrot.lane.b32.xlu0 %v6868_v1, %s6705_s25  ;;  %v6873_v2 = vcombine.high %v6868_v1, %v6868_v1  ;;  %v919_v32 = vsel %vm445_vm2, %v6868_v1, 0  ;;  %v991_v37 = vsub.f32 %v917_v31, %v990_v34  ;;  %v1475_v61 = vsub.f32 %v1401_v55, %v1474_v58  ;;  %s6387_s16 = sshll.u32 %s392_s12, 3 }
  0x3e   : > { %v521_v12 = vsub.f32 %v519_v6, %v520_v7  ;;  %v925_v35 = vand.u32 4294901760, %v919_v32 }
  0x3f   : > { %1393 = vrot.lane.b32.xlu1 %v6873_v2, %s6706_s30  ;;  %v921_v28 = vsel %vm445_vm2, %v6873_v2, 0  ;;  %v992_v40 = vand.u32 4294901760, %v991_v37 }
  0x40   : > { %v522_v18 = vand.u32 4294901760, %v521_v12  ;;  %v923_v29 = vand.u32 4294901760, %v921_v28  ;;  %v1008_v38 = vsub.f32 %v919_v32, %v925_v35 }
  0x41   : > { %435 = vrot.lane.b32.xlu0 %v6873_v2, %s6705_s25  ;;  %v993_v43 = vsub.f32 %v991_v37, %v992_v40  ;;  %s6708_s25 = smov 1  }
  0x42   : > { %v1002_v33 = vsub.f32 %v921_v28, %v923_v29  ;;  %v1009_v41 = vand.u32 4294901760, %v1008_v38 }
  0x43   : > { %1395 = vrot.lane.b32.xlu1 %v6704_v0, %s6706_s30  ;;  %v994_v45 = vand.u32 4294901760, %v993_v43 }
  0x44   : > { %v1003_v36 = vand.u32 4294901760, %v1002_v33  ;;  %v1010_v44 = vsub.f32 %v1008_v38, %v1009_v41 }
  0x45   : > { %1391 = vrot.lane.b32.xlu0 %v6868_v1, %s6706_s30  ;;  %v1476_v1 = vand.u32 4294901760, %v1475_v61  ;;  %s6709_s30 = smov 127  }
  0x46   : > { %v1004_v39 = vsub.f32 %v1002_v33, %v1003_v36  ;;  %v1011_v46 = vand.u32 4294901760, %v1010_v44 }
  0x47   : > { %1877 = vperm.xlu1 %6601, %v1874_v26  }
  0x48   : > { %v1005_v42 = vand.u32 4294901760, %v1004_v39 }
  0xaf   : > { %v434_v8 = vpop.permute.xlu0 %433 }
  0xb0   : > { %v440_v9 = vsel %vm437_vm1, 0.0, %v434_v8 }
  0xb1   : > { %v447_v10 = vsel %vm445_vm2, %v440_v9, 0  ;;  %v1394_v47 = vpop.permute.xlu1 %1393 }
  0xb2   : > { %v453_v11 = vand.u32 4294901760, %v447_v10 }
  0xb3   : > { %v436_v13 = vpop.permute.xlu0 %435 }
  0xb4   : > { %v536_v14 = vsub.f32 %v447_v10, %v453_v11  ;;  %v438_v15 = vsel %vm437_vm1, %v434_v8, %v436_v13 }
  0xb5   : > { %v449_v16 = vsel %vm445_vm2, %v438_v15, 0  ;;  %v1396_v48 = vpop.permute.xlu1 %1395 }
  0xb6   : > { %v451_v17 = vand.u32 4294901760, %v449_v16  ;;  %v537_v19 = vand.u32 4294901760, %v536_v14  ;;  %v1399_v49 = vsel %vm1397_vm3, %v1394_v47, %v1396_v48 }
  0xb7   : > { %v1405_v50 = vsel %vm445_vm2, %v1399_v49, 0  ;;  %v1392_v52 = vpop.permute.xlu0 %1391  ;;  %v6392_v49 = vld [vmem:[%s7133_s3 + $0x4] sm:$0xf] }
  0xb8   : > { %v530_v20 = vsub.f32 %v449_v16, %v451_v17  ;;  %452 = vmatprep.subr.mxu0 %v451_v17  ;;  %v538_v22 = vsub.f32 %v536_v14, %v537_v19  ;;  %v1407_v51 = vand.u32 4294901760, %v1405_v50  ;;  %v1398_v54 = vsel %vm1397_vm3, %v1392_v52, %v1394_v47  ;;  %v3341_v16 = vld [vmem:[%s7134_s4] sm:$0xf] }
  0xb9   : > { %454 = vmatpush1.msra.mxu0 %v453_v11  ;;  %v1403_v57 = vsel %vm445_vm2, %v1398_v54, 0  ;;  %v3349_v47 = vld [vmem:[%s7135_s5] sm:$0xf] }
  0xba   : > { %523 = vmatmul.mubr.f32.vlgmr.msra.gmra.mrb[0].mxu0 %v522_v18  ;;  %v531_v21 = vand.u32 4294901760, %v530_v20  ;;  %v539_v25 = vand.u32 4294901760, %v538_v22  ;;  %v1486_v56 = vsub.f32 %v1405_v50, %v1407_v51  ;;  %v1409_v60 = vand.u32 4294901760, %v1403_v57 }
  0xbb   : > { %603 = vmatprep.mubr.f32.mxu0 %v6704_v0  ;;  %v401_v18 = vlaneseq }
  0xbc   : > { %v532_v23 = vsub.f32 %v530_v20, %v531_v21  ;;  %v1487_v59 = vand.u32 4294901760, %v1486_v56  ;;  %v1492_v63 = vsub.f32 %v1403_v57, %v1409_v60 }
  0xbe   : > { %v533_v24 = vand.u32 4294901760, %v532_v23  ;;  %v1488_v62 = vsub.f32 %v1486_v56, %v1487_v59  ;;  %v1493_v4 = vand.u32 4294901760, %v1492_v63 }
  0xc0   : > { %534 = vmatprep.subr.mxu0 %v533_v24  ;;  %v1489_v3 = vand.u32 4294901760, %v1488_v62 }
  0xc1   : > { %540 = vmatpush1.msra.mxu0 %v539_v25 }
  0xc2   : > { %605 = vmatmul.mubr.f32.vlgmr.msra.gmra.mrb[0].mxu0 %v6883_v5  ;;  %613 = vmatprep.subr.mxu0 %v530_v20  ;;  %v402_v20 = vand.u32 127, %v401_v18 }
  0xc3   : > { %616 = vmatpush1.msra.mxu0 %v536_v14  ;;  %679 = vmatprep.mubr.f32.mxu0 %v6704_v0 }
  0xc4   : > { %689 = vmatprep.subr.mxu0 %v451_v17  ;;  %v403_v22 = vadd.s32 128, %v402_v20  ;;  %v6941_v24 = vand.u32 15, %v402_v20 }
  0xc6   : > { %v1878_v9 = vpop.permute.xlu1 %1877  ;;  %v6943_v25 = vand.u32 15, %v403_v22  ;;  %vm1884_vm5 = vcmp.ge.s32.totalorder %v6941_v24, 1  ;;  %vm1899_vm9 = vcmp.lt.s32.totalorder %v6941_v24, 15  ;;  %vm4812_vm13 = vcmp.ge.s32.totalorder %v6941_v24, 2 }
  0xc7   : > { %vm4827_vm3 = vcmp.lt.s32.totalorder %v6941_v24, 14 }
  0xc8   : > { %vm1885_vm6 = vcmp.ge.s32.totalorder %v6943_v25, 1  ;;  %vm1900_vm8 = vcmp.lt.s32.totalorder %v6943_v25, 15  ;;  %vm4813_vm14 = vcmp.ge.s32.totalorder %v6943_v25, 2  ;;  %vm4828_vm1 = vcmp.lt.s32.totalorder %v6943_v25, 14 }
  0xca   : > { %682 = vmatmul.mubr.f32.vlgmr.msra.gmra.mrb[0].mxu0 %v519_v6  ;;  %v1494_v6 = vsub.f32 %v1492_v63, %v1493_v4 }
  0xcb   : > { %691 = vmatpush1.msra.mxu0 %v453_v11  ;;  %754 = vmatprep.mubr.f32.mxu0 %v6704_v0 }
  0xcc   : > { %767 = vmatprep.subr.mxu0 %v531_v21  ;;  %v1495_v8 = vand.u32 4294901760, %v1494_v6 }
  0xd2   : > { %758 = vmatmul.mubr.f32.vlgmr.msra.gmra.mrb[0].mxu0 %v520_v7 }
  0xd3   : > { %771 = vmatpush1.msra.mxu0 %v537_v19  ;;  %834 = vmatprep.mubr.f32.mxu0 %v6704_v0 }
  0xd4   : > { %843 = vmatprep.subr.mxu0 %v451_v17  ;;  %v1916_v17 = vld [vmem:[%s7133_s3] sm:$0xf] }
  0xd5   : > { %v1918_v19 = vsel %vm441_vm0, %v1916_v17, 0 }
  0xd6   : > { %v6938_v21 = vand.u32 4294901760, %v1918_v19 }
  0xd8   : > { %v1994_v23 = vsub.f32 %v1918_v19, %v6938_v21 }
  0xda   : > { %836 = vmatmul.mubr.f32.vlgmr.msra.gmra.mrb[0].mxu0 %v6883_v5  ;;  %v1995_v26 = vand.u32 4294901760, %v1994_v23 }
  0xdb   : > { %845 = vmatpush1.msra.mxu0 %v453_v11  ;;  %908 = vmatprep.mubr.f32.mxu0 %v6704_v0 }
  0xdc   : > { %924 = vmatprep.subr.mxu0 %v923_v29  ;;  %v1996_v30 = vsub.f32 %v1994_v23, %v1995_v26 }
  0xe2   : > { %910 = vmatmul.mubr.f32.vlgmr.msra.gmra.mrb[0].mxu0 %v6883_v5  ;;  %v1477_v5 = vsub.f32 %v1475_v61, %v1476_v1 }
  0xe3   : > { %926 = vmatpush1.msra.mxu0 %v925_v35  ;;  %989 = vmatprep.mubr.f32.mxu0 %v6704_v0 }
  0xe4   : > { %1006 = vmatprep.subr.mxu0 %v1005_v42  ;;  %v1478_v7 = vand.u32 4294901760, %v1477_v5 }
  0xea   : > { %995 = vmatmul.mubr.f32.vlgmr.msra.gmra.mrb[0].mxu0 %v994_v45 }
  0xeb   : > { %1012 = vmatpush1.msra.mxu0 %v1011_v46  ;;  %1075 = vmatprep.mubr.f32.mxu0 %v6704_v0 }
  0xec   : > { %1085 = vmatprep.subr.mxu0 %v1002_v33 }
  0xf2   : > { %1077 = vmatmul.mubr.f32.vlgmr.msra.gmra.mrb[0].mxu0 %v990_v34 }
  0xf3   : > { %1088 = vmatpush1.msra.mxu0 %v1008_v38  ;;  %1151 = vmatprep.mubr.f32.mxu0 %v6704_v0  ;;  %v1997_v38 = vand.u32 4294901760, %v1996_v30 }
  0xf4   : > { %1161 = vmatprep.subr.mxu0 %v923_v29 }
  0xfa   : > { %1154 = vmatmul.mubr.f32.vlgmr.msra.gmra.mrb[0].mxu0 %v991_v37 }
  0xfb   : > { %1163 = vmatpush1.msra.mxu0 %v925_v35  ;;  %1226 = vmatprep.mubr.f32.mxu0 %v6704_v0 }
  0xfc   : > { %1239 = vmatprep.subr.mxu0 %v1003_v36 }
 0x102   : > { %1230 = vmatmul.mubr.f32.vlgmr.msra.gmra.mrb[0].mxu0 %v992_v40 }
 0x103   : > { %1243 = vmatpush1.msra.mxu0 %v1009_v41  ;;  %1306 = vmatprep.mubr.f32.mxu0 %v6704_v0 }
 0x104   : > { %1315 = vmatprep.subr.mxu0 %v923_v29 }
 0x10a   : > { %1308 = vmatmul.mubr.f32.vlgmr.msra.gmra.mrb[0].mxu0 %v990_v34 }
 0x10b   : > { %1317 = vmatpush1.msra.mxu0 %v925_v35  ;;  %1380 = vmatprep.mubr.f32.mxu0 %v6704_v0 }
 0x10c   : > { %1408 = vmatprep.subr.mxu0 %v1407_v51 }
 0x112   : > { %1382 = vmatmul.mubr.f32.vlgmr.msra.gmra.mrb[0].mxu0 %v990_v34 }
 0x113   : > { %1410 = vmatpush1.msra.mxu0 %v1409_v60  ;;  %1473 = vmatprep.mubr.f32.mxu0 %v6704_v0 }
 0x114   : > { %1490 = vmatprep.subr.mxu0 %v1489_v3 }
 0x11a   : > { %1479 = vmatmul.mubr.f32.vlgmr.msra.gmra.mrb[0].mxu0 %v1478_v7 }
 0x11b   : > { %1496 = vmatpush1.msra.mxu0 %v1495_v8  ;;  %1559 = vmatprep.mubr.f32.mxu0 %v6704_v0 }
 0x11c   : > { %1569 = vmatprep.subr.mxu0 %v1486_v56 }
 0x122   : > { %1561 = vmatmul.mubr.f32.vlgmr.msra.gmra.mrb[0].mxu0 %v1474_v58 }
 0x123   : > { %1572 = vmatpush1.msra.mxu0 %v1492_v63  ;;  %1635 = vmatprep.mubr.f32.mxu0 %v6704_v0 }
 0x124   : > { %1645 = vmatprep.subr.mxu0 %v1407_v51 }
 0x12a   : > { %1638 = vmatmul.mubr.f32.vlgmr.msra.gmra.mrb[0].mxu0 %v1475_v61 }
 0x12b   : > { %1647 = vmatpush1.msra.mxu0 %v1409_v60  ;;  %1710 = vmatprep.mubr.f32.mxu0 %v6704_v0 }
 0x12c   : > { %1723 = vmatprep.subr.mxu0 %v1487_v59 }
 0x132   : > { %1714 = vmatmul.mubr.f32.vlgmr.msra.gmra.mrb[0].mxu0 %v1476_v1 }
 0x133   : > { %1727 = vmatpush1.msra.mxu0 %v1493_v4  ;;  %1790 = vmatprep.mubr.f32.mxu0 %v6704_v0 }
 0x134   : > { %1799 = vmatprep.subr.mxu0 %v1407_v51  ;;  %v2392_v51 = vsel %vm441_vm0, %v6392_v49, 0 }
 0x135   : > { %v6964_v54 = vand.u32 4294901760, %v2392_v51 }
 0x137   : > { %v2466_v57 = vsub.f32 %v2392_v51, %v6964_v54 }
 0x13a   : > { %1792 = vmatmul.mubr.f32.vlgmr.msra.gmra.mrb[0].mxu0 %v1474_v58 }
 0x13b   : > { %1801 = vmatpush1.msra.mxu0 %v1409_v60  ;;  %1864 = vmatprep.mubr.f32.mxu0 %v6704_v0  ;;  %v2467_v60 = vand.u32 4294901760, %v2466_v57 }
 0x13d   : > { %v2468_v63 = vsub.f32 %v2466_v57, %v2467_v60 }
 0x13f   : > { %v2469_v3 = vand.u32 4294901760, %v2468_v63 }
 0x142   : > { %1866 = vmatmul.mubr.f32.vlgmr.msra.gmra.mrb[0].mxu0 %v1474_v58 }
 0x143   : > { %3446 = vmatprep.mubr.f32.mxu0 %v6704_v0 }
 0x215   : > { %v1867_v10 = vpop.f32.mrb[0].mxu0 }
 0x216   : > { %v1880_v11 = vadd.f32 %v1878_v9, %v1867_v10  ;;  %v1869_v12 = vpop.f32.mrb[1].mxu0 }
 0x217   : > { %v1881_v13 = vadd.f32 %v1878_v9, %v1869_v12  ;;  %v6393_v12 = vld [vmem:[%s7133_s3 + $0x8] sm:$0xf] }
 0x218   : > { %v6926_v14 = vmax.f32 %v1880_v11, 0.0 }
 0x219   : > { %v1883_v15 = vmax.f32 %v1881_v13, 0.0 }
 0x21a   : > { %1888 = vrot.lane.b32.xlu0 %v6926_v14, %s6708_s25  ;;  %v2394_v52 = vsel %vm445_vm2, %v6926_v14, 0 }
 0x21b   : > { %1890 = vrot.lane.b32.xlu1 %v1883_v15, %s6708_s25  ;;  %v2396_v48 = vsel %vm445_vm2, %v1883_v15, 0  ;;  %v2400_v55 = vand.u32 4294901760, %v2394_v52  ;;  %s6402_s25 = sshll.u32 %s6796_s21, 7  ;;  %s6714_s21 = smov [#allocation5]  }
 0x21c   : > { %v2398_v50 = vand.u32 4294901760, %v2396_v48  ;;  %s7088_s24 = scalar_lea.hbm %s7141_s11, %s6402_s25  ;;  %s6637_s13 = sshll.u32 %s6714_s21, 4  ;;  %s6638_s13 = int_to_ptr.vmem [resolvable:$false] %s6637_s13 }
 0x21d   : > { %v2483_v58 = vsub.f32 %v2394_v52, %v2400_v55 }
 0x21e   : > { %1903 = vrot.lane.b32.xlu0 %v1883_v15, %s6709_s30  ;;  %v2477_v53 = vsub.f32 %v2396_v48, %v2398_v50  ;;  %v2866_v15 = vsel %vm441_vm0, %v6393_v12, 0 }
 0x21f   : > { %1905 = vrot.lane.b32.xlu1 %v6704_v0, %s6709_s30  ;;  %v2484_v61 = vand.u32 4294901760, %v2483_v58  ;;  %v2941_v18 = vand.u32 4294901760, %v2866_v15 }
 0x220   : > { %v2478_v56 = vand.u32 4294901760, %v2477_v53 }
 0x221   : > { %v2485_v1 = vsub.f32 %v2483_v58, %v2484_v61 }
 0x222   : > { %1901 = vrot.lane.b32.xlu0 %v6926_v14, %s6709_s30  ;;  %v2479_v59 = vsub.f32 %v2477_v53, %v2478_v56  ;;  %s394_s30 = scalar_lea.vmem [#allocation5], %s6387_s16  ;;  %s6639_s16 = scalar_lea.vmem %s6638_s13, 256 }
 0x223   : > { %3344 = vperm.xlu1 %6601, %v3341_v16   ;;  %v2486_v4 = vand.u32 4294901760, %v2485_v1 }
 0x224   : > { %v2480_v62 = vand.u32 4294901760, %v2479_v59 }
 0x226   : > { %3352 = vperm.xlu0 %6602, %v3349_v47  }
 0x28c   : > { %v1889_v27 = vpop.permute.xlu0 %1888 }
 0x28d   : > { %v1896_v28 = vsel %vm1892_vm4, 0.0, %v1889_v27  ;;  %v1891_v29 = vpop.permute.xlu1 %1890 }
 0x28e   : > { %v1897_v31 = vsel %vm1884_vm5, %v1896_v28, 0.0  ;;  %v1893_v32 = vsel %vm1892_vm4, %v1889_v27, %v1891_v29 }
 0x28f   : > { %v1921_v33 = vsel %vm445_vm2, %v1897_v31, 0  ;;  %v1898_v34 = vsel %vm1885_vm6, %v1893_v32, 0.0 }
 0x290   : > { %v1928_v35 = vand.u32 4294901760, %v1921_v33  ;;  %v1924_v36 = vsel %vm445_vm2, %v1898_v34, 0  ;;  %v1904_v5 = vpop.permute.xlu0 %1903 }
 0x291   : > { %v1926_v37 = vand.u32 4294901760, %v1924_v36  ;;  %v1906_v6 = vpop.permute.xlu1 %1905 }
 0x292   : > { %v2011_v39 = vsub.f32 %v1921_v33, %v1928_v35  ;;  %v1909_v7 = vsel %vm1907_vm7, %v1904_v5, %v1906_v6  ;;  %v6394_v6 = vld [vmem:[%s7136_s6 + $0x4] sm:$0xf] }
 0x293   : > { %v2005_v40 = vsub.f32 %v1924_v36, %v1926_v37  ;;  %1927 = vmatprep.subr.mxu1 %v1926_v37  ;;  %v1913_v8 = vsel %vm1900_vm8, %v1909_v7, 0.0 }
 0x294   : > { %v2012_v41 = vand.u32 4294901760, %v2011_v39  ;;  %1929 = vmatpush1.msra.mxu1 %v1928_v35  ;;  %v1902_v9 = vpop.permute.xlu0 %1901  ;;  %v2872_v10 = vsel %vm445_vm2, %v1913_v8, 0  ;;  %v3846_v8 = vsel %vm441_vm0, %v6394_v6, 0 }
 0x295   : > { %1998 = vmatmul.mubr.f32.vlgmr.msra.gmra.mrb[0].mxu1 %v1997_v38  ;;  %v2006_v42 = vand.u32 4294901760, %v2005_v40  ;;  %v1908_v11 = vsel %vm1907_vm7, %v1902_v9, %v1904_v5  ;;  %v2874_v13 = vand.u32 4294901760, %v2872_v10 }
 0x296   : > { %v2013_v43 = vsub.f32 %v2011_v39, %v2012_v41  ;;  %2078 = vmatprep.mubr.f32.mxu1 %v6704_v0  ;;  %v1912_v14 = vsel %vm1899_vm9, %v1908_v11, 0.0  ;;  %v3919_v11 = vand.u32 4294901760, %v3846_v8 }
 0x297   : > { %v2007_v44 = vsub.f32 %v2005_v40, %v2006_v42  ;;  %v2953_v16 = vsub.f32 %v2872_v10, %v2874_v13  ;;  %v2869_v17 = vsel %vm445_vm2, %v1912_v14, 0 }
 0x298   : > { %v2014_v46 = vand.u32 4294901760, %v2013_v43  ;;  %v2876_v19 = vand.u32 4294901760, %v2869_v17  ;;  %v4802_v43 = vld [vmem:[%s7137_s7] sm:$0xf]  ;;  %v3920_v14 = vsub.f32 %v3846_v8, %v3919_v11 }
 0x299   : > { %v2008_v45 = vand.u32 4294901760, %v2007_v44  ;;  %v2954_v20 = vand.u32 4294901760, %v2953_v16  ;;  %v3361_v44 = vld [vmem:[%s7136_s6] sm:$0xf] }
 0x29a   : > { %v2959_v22 = vsub.f32 %v2869_v17, %v2876_v19  ;;  %v3921_v17 = vand.u32 4294901760, %v3920_v14 }
 0x29b   : > { %2009 = vmatprep.subr.mxu1 %v2008_v45  ;;  %v3373_v45 = vsel %vm441_vm0, %v3361_v44, 0 }
 0x29c   : > { %2015 = vmatpush1.msra.mxu1 %v2014_v46  ;;  %v2960_v27 = vand.u32 4294901760, %v2959_v22  ;;  %v3447_v46 = vand.u32 4294901760, %v3373_v45 }
 0x29d   : > { %2080 = vmatmul.mubr.f32.vlgmr.msra.gmra.mrb[0].mxu1 %v6938_v21  ;;  %2088 = vmatprep.subr.mxu1 %v2005_v40 }
 0x29e   : > { %2091 = vmatpush1.msra.mxu1 %v2011_v39  ;;  %2154 = vmatprep.mubr.f32.mxu1 %v6704_v0  ;;  %v2961_v30 = vsub.f32 %v2959_v22, %v2960_v27  ;;  %v3448_v47 = vsub.f32 %v3373_v45, %v3447_v46 }
 0x29f   : > { %2164 = vmatprep.subr.mxu1 %v1926_v37 }
 0x2a0   : > { %v2962_v32 = vand.u32 4294901760, %v2961_v30  ;;  %v3449_v48 = vand.u32 4294901760, %v3448_v47 }
 0x2a2   : > { %v3345_v33 = vpop.permute.xlu1 %3344 }
 0x2a5   : > { %2157 = vmatmul.mubr.f32.vlgmr.msra.gmra.mrb[0].mxu1 %v1994_v23  ;;  %v2955_v23 = vsub.f32 %v2953_v16, %v2954_v20 }
 0x2a6   : > { %2166 = vmatpush1.msra.mxu1 %v1928_v35  ;;  %2229 = vmatprep.mubr.f32.mxu1 %v6704_v0 }
 0x2a7   : > { %2242 = vmatprep.subr.mxu1 %v2006_v42  ;;  %v2956_v28 = vand.u32 4294901760, %v2955_v23 }
 0x2ad   : > { %2233 = vmatmul.mubr.f32.vlgmr.msra.gmra.mrb[0].mxu1 %v1995_v26 }
 0x2ae   : > { %2246 = vmatpush1.msra.mxu1 %v2012_v41  ;;  %2309 = vmatprep.mubr.f32.mxu1 %v6704_v0 }
 0x2af   : > { %2318 = vmatprep.subr.mxu1 %v1926_v37 }
 0x2b5   : > { %2311 = vmatmul.mubr.f32.vlgmr.msra.gmra.mrb[0].mxu1 %v6938_v21 }
 0x2b6   : > { %2320 = vmatpush1.msra.mxu1 %v1928_v35  ;;  %2383 = vmatprep.mubr.f32.mxu1 %v6704_v0  ;;  %v3353_v35 = vpop.permute.xlu0 %3352 }
 0x2b7   : > { %2399 = vmatprep.subr.mxu1 %v2398_v50 }
 0x2bd   : > { %2385 = vmatmul.mubr.f32.vlgmr.msra.gmra.mrb[0].mxu1 %v6938_v21  ;;  %v2942_v21 = vsub.f32 %v2866_v15, %v2941_v18 }
 0x2be   : > { %2401 = vmatpush1.msra.mxu1 %v2400_v55  ;;  %2464 = vmatprep.mubr.f32.mxu1 %v6704_v0 }
 0x2bf   : > { %2481 = vmatprep.subr.mxu1 %v2480_v62  ;;  %v2943_v26 = vand.u32 4294901760, %v2942_v21 }
 0x2c1   : > { %v2944_v29 = vsub.f32 %v2942_v21, %v2943_v26 }
 0x2c3   : > { %v2945_v31 = vand.u32 4294901760, %v2944_v29 }
 0x2c5   : > { %2470 = vmatmul.mubr.f32.vlgmr.msra.gmra.mrb[0].mxu1 %v2469_v3 }
 0x2c6   : > { %2487 = vmatpush1.msra.mxu1 %v2486_v4  ;;  %2550 = vmatprep.mubr.f32.mxu1 %v6704_v0 }
 0x2c7   : > { %2560 = vmatprep.subr.mxu1 %v2477_v53  ;;  %v3450_v53 = vsub.f32 %v3448_v47, %v3449_v48 }
 0x2c9   : > { %v3451_v59 = vand.u32 4294901760, %v3450_v53 }
 0x2cd   : > { %2552 = vmatmul.mubr.f32.vlgmr.msra.gmra.mrb[0].mxu1 %v6964_v54 }
 0x2ce   : > { %2563 = vmatpush1.msra.mxu1 %v2483_v58  ;;  %2626 = vmatprep.mubr.f32.mxu1 %v6704_v0 }
 0x2cf   : > { %2636 = vmatprep.subr.mxu1 %v2398_v50 }
 0x2d5   : > { %2629 = vmatmul.mubr.f32.vlgmr.msra.gmra.mrb[0].mxu1 %v2466_v57 }
 0x2d6   : > { %2638 = vmatpush1.msra.mxu1 %v2400_v55  ;;  %2701 = vmatprep.mubr.f32.mxu1 %v6704_v0 }
 0x2d7   : > { %2714 = vmatprep.subr.mxu1 %v2478_v56 }
 0x2dd   : > { %2705 = vmatmul.mubr.f32.vlgmr.msra.gmra.mrb[0].mxu1 %v2467_v60 }
 0x2de   : > { %2718 = vmatpush1.msra.mxu1 %v2484_v61  ;;  %2781 = vmatprep.mubr.f32.mxu1 %v6704_v0 }
 0x2df   : > { %2790 = vmatprep.subr.mxu1 %v2398_v50 }
 0x2e5   : > { %2783 = vmatmul.mubr.f32.vlgmr.msra.gmra.mrb[0].mxu1 %v6964_v54 }
 0x2e6   : > { %2792 = vmatpush1.msra.mxu1 %v2400_v55  ;;  %2855 = vmatprep.mubr.f32.mxu1 %v6704_v0 }
 0x2e7   : > { %2875 = vmatprep.subr.mxu1 %v2874_v13 }
 0x2ed   : > { %2857 = vmatmul.mubr.f32.vlgmr.msra.gmra.mrb[0].mxu1 %v6964_v54 }
 0x2ee   : > { %2877 = vmatpush1.msra.mxu1 %v2876_v19  ;;  %2940 = vmatprep.mubr.f32.mxu1 %v6704_v0 }
 0x2ef   : > { %2957 = vmatprep.subr.mxu1 %v2956_v28 }
 0x2f5   : > { %2946 = vmatmul.mubr.f32.vlgmr.msra.gmra.mrb[0].mxu1 %v2945_v31  ;;  %v6395_v31 = vld [vmem:[%s7136_s6 + $0x8] sm:$0xf] }
 0x2f6   : > { %2963 = vmatpush1.msra.mxu1 %v2962_v32  ;;  %3026 = vmatprep.mubr.f32.mxu1 %v6704_v0 }
 0x2f7   : > { %3036 = vmatprep.subr.mxu1 %v2953_v16 }
 0x2fd   : > { %3028 = vmatmul.mubr.f32.vlgmr.msra.gmra.mrb[0].mxu1 %v2941_v18 }
 0x2fe   : > { %3039 = vmatpush1.msra.mxu1 %v2959_v22  ;;  %3102 = vmatprep.mubr.f32.mxu1 %v6704_v0 }
 0x2ff   : > { %3112 = vmatprep.subr.mxu1 %v2874_v13 }
 0x305   : > { %3105 = vmatmul.mubr.f32.vlgmr.msra.gmra.mrb[0].mxu1 %v2942_v21 }
 0x306   : > { %3114 = vmatpush1.msra.mxu1 %v2876_v19  ;;  %3177 = vmatprep.mubr.f32.mxu1 %v6704_v0 }
 0x307   : > { %3190 = vmatprep.subr.mxu1 %v2954_v20  ;;  %v3922_v20 = vsub.f32 %v3920_v14, %v3921_v17 }
 0x309   : > { %v3923_v22 = vand.u32 4294901760, %v3922_v20 }
 0x30d   : > { %3181 = vmatmul.mubr.f32.vlgmr.msra.gmra.mrb[0].mxu1 %v2943_v26 }
 0x30e   : > { %3194 = vmatpush1.msra.mxu1 %v2960_v27  ;;  %3257 = vmatprep.mubr.f32.mxu1 %v6704_v0 }
 0x30f   : > { %3266 = vmatprep.subr.mxu1 %v2874_v13 }
 0x315   : > { %3259 = vmatmul.mubr.f32.vlgmr.msra.gmra.mrb[0].mxu1 %v2941_v18 }
 0x316   : > { %3268 = vmatpush1.msra.mxu1 %v2876_v19  ;;  %3331 = vmatprep.mubr.f32.mxu1 %v6704_v0 }
 0x31d   : > { %3333 = vmatmul.mubr.f32.vlgmr.msra.gmra.mrb[0].mxu1 %v2941_v18 }
 0x31e   : > { %4920 = vmatprep.mubr.f32.mxu1 %v6704_v0 }
 0x3f0   : > { %v3334_v34 = vpop.f32.mrb[0].mxu1 }
 0x3f1   : > { %v3347_v36 = vmul.f32 %v3345_v33, %v3334_v34  ;;  %v3336_v37 = vpop.f32.mrb[1].mxu1  ;;  %v4329_v34 = vsel %vm441_vm0, %v6395_v31, 0 }
 0x3f2   : > { %v3348_v38 = vmul.f32 %v3345_v33, %v3336_v37  ;;  %v4402_v37 = vand.u32 4294901760, %v4329_v34 }
 0x3f3   : > { %v3355_v39 = vadd.f32 %v3353_v35, %v3347_v36 }
 0x3f4   : > { %v3356_v40 = vadd.f32 %v3353_v35, %v3348_v38 }
 0x3f5   : > { %v3357_v41 = vmax.f32 %v3355_v39, 0.0 }
 0x3f6   : > { %v3358_v42 = vmax.f32 %v3356_v40, 0.0  ;;  %v4403_v40 = vsub.f32 %v4329_v34, %v4402_v37 }
 0x3f7   : > { %3364 = vrot.lane.b32.xlu1 %v3357_v41, %s6710_s14  ;;  %v3848_v9 = vsel %vm445_vm2, %v3357_v41, 0 }
 0x3f8   : > { %4321 = vrot.lane.b32.xlu0 %v3358_v42, %s6711_s15  ;;  %v3850_v5 = vsel %vm445_vm2, %v3358_v42, 0  ;;  %v3854_v12 = vand.u32 4294901760, %v3848_v9 }
 0x3f9   : > { %v3852_v7 = vand.u32 4294901760, %v3850_v5 }
 0x3fa   : > { %v3937_v15 = vsub.f32 %v3848_v9, %v3854_v12 }
 0x3fb   : > { %3366 = vrot.lane.b32.xlu1 %v3358_v42, %s6710_s14  ;;  %v3931_v10 = vsub.f32 %v3850_v5, %v3852_v7  ;;  %s6712_s14 = smov 2  }
 0x3fc   : > { %4319 = vrot.lane.b32.xlu0 %v3357_v41, %s6711_s15  ;;  %v3938_v18 = vand.u32 4294901760, %v3937_v15 }
 0x3fd   : > { %v3932_v13 = vand.u32 4294901760, %v3931_v10 }
 0x3fe   : > { %v3939_v21 = vsub.f32 %v3937_v15, %v3938_v18 }
 0x3ff   : > { %4323 = vrot.lane.b32.xlu1 %v6704_v0, %s6711_s15  ;;  %v3933_v16 = vsub.f32 %v3931_v10, %v3932_v13  ;;  %s6713_s15 = smov 126  }
 0x400   : > { %v3940_v23 = vand.u32 4294901760, %v3939_v21 }
 0x401   : > { %v3934_v19 = vand.u32 4294901760, %v3933_v16 }
 0x403   : > { %4805 = vperm.xlu1 %6601, %v4802_v43   ;;  %v4404_v43 = vand.u32 4294901760, %v4403_v40 }
 0x469   : > { %v3365_v49 = vpop.permute.xlu1 %3364 }
 0x46a   : > { %v3371_v50 = vsel %vm3368_vm10, 0.0, %v3365_v49  ;;  %v4322_v27 = vpop.permute.xlu0 %4321 }
 0x46b   : > { %v3376_v51 = vsel %vm445_vm2, %v3371_v50, 0 }
 0x46c   : > { %v3382_v52 = vand.u32 4294901760, %v3376_v51 }
 0x46d   : > { %v3367_v54 = vpop.permute.xlu1 %3366 }
 0x46e   : > { %v3465_v55 = vsub.f32 %v3376_v51, %v3382_v52  ;;  %v3369_v56 = vsel %vm3368_vm10, %v3365_v49, %v3367_v54  ;;  %v4320_v30 = vpop.permute.xlu0 %4319 }
 0x46f   : > { %v3378_v57 = vsel %vm445_vm2, %v3369_v56, 0  ;;  %v4326_v33 = vsel %vm4325_vm11, %v4320_v30, %v4322_v27 }
 0x470   : > { %v3380_v58 = vand.u32 4294901760, %v3378_v57  ;;  %v3466_v60 = vand.u32 4294901760, %v3465_v55  ;;  %v4331_v35 = vsel %vm445_vm2, %v4326_v33, 0 }
 0x471   : > { %v4324_v26 = vpop.permute.xlu1 %4323  ;;  %v4337_v38 = vand.u32 4294901760, %v4331_v35 }
 0x472   : > { %v3459_v61 = vsub.f32 %v3378_v57, %v3380_v58  ;;  %3381 = vmatprep.subr.mxu0 %v3380_v58  ;;  %v3467_v63 = vsub.f32 %v3465_v55, %v3466_v60  ;;  %v4327_v28 = vsel %vm4325_vm11, %v4322_v27, %v4324_v26  ;;  %v6269_v57 = vld [vmem:[%s7139_s9] sm:$0xf] }
 0x473   : > { %3383 = vmatpush1.msra.mxu0 %v3382_v52  ;;  %v4333_v29 = vsel %vm445_vm2, %v4327_v28, 0  ;;  %v4420_v41 = vsub.f32 %v4331_v35, %v4337_v38 }
 0x474   : > { %3452 = vmatmul.mubr.f32.vlgmr.msra.gmra.mrb[2].mxu0 %v3451_v59  ;;  %v3460_v62 = vand.u32 4294901760, %v3459_v61  ;;  %v3468_v4 = vand.u32 4294901760, %v3467_v63  ;;  %v4335_v32 = vand.u32 4294901760, %v4333_v29  ;;  %v4844_v59 = vld [vmem:[#allocation2] sm:$0xf] }
 0x475   : > { %3532 = vmatprep.mubr.f32.mxu0 %v6704_v0  ;;  %v4421_v44 = vand.u32 4294901760, %v4420_v41 }
 0x476   : > { %v3461_v1 = vsub.f32 %v3459_v61, %v3460_v62  ;;  %v4414_v36 = vsub.f32 %v4333_v29, %v4335_v32 }
 0x478   : > { %v3462_v3 = vand.u32 4294901760, %v3461_v1  ;;  %v4415_v39 = vand.u32 4294901760, %v4414_v36 }
 0x47a   : > { %3463 = vmatprep.subr.mxu0 %v3462_v3  ;;  %v4416_v42 = vsub.f32 %v4414_v36, %v4415_v39 }
 0x47b   : > { %3469 = vmatpush1.msra.mxu0 %v3468_v4 }
 0x47c   : > { %3534 = vmatmul.mubr.f32.vlgmr.msra.gmra.mrb[2].mxu0 %v3447_v46  ;;  %3542 = vmatprep.subr.mxu0 %v3459_v61  ;;  %v4417_v45 = vand.u32 4294901760, %v4416_v42 }
 0x47d   : > { %3545 = vmatpush1.msra.mxu0 %v3465_v55  ;;  %3608 = vmatprep.mubr.f32.mxu0 %v6704_v0 }
 0x47e   : > { %3618 = vmatprep.subr.mxu0 %v3380_v58 }
 0x482   : > { %v4806_v50 = vpop.permute.xlu1 %4805 }
 0x484   : > { %3611 = vmatmul.mubr.f32.vlgmr.msra.gmra.mrb[2].mxu0 %v3448_v47  ;;  %v4422_v47 = vsub.f32 %v4420_v41, %v4421_v44 }
 0x485   : > { %3620 = vmatpush1.msra.mxu0 %v3382_v52  ;;  %3683 = vmatprep.mubr.f32.mxu0 %v6704_v0 }
 0x486   : > { %3696 = vmatprep.subr.mxu0 %v3460_v62  ;;  %v4423_v49 = vand.u32 4294901760, %v4422_v47 }
 0x48c   : > { %3687 = vmatmul.mubr.f32.vlgmr.msra.gmra.mrb[2].mxu0 %v3449_v48 }
 0x48d   : > { %3700 = vmatpush1.msra.mxu0 %v3466_v60  ;;  %3763 = vmatprep.mubr.f32.mxu0 %v6704_v0  ;;  %v4846_v60 = vsel %vm441_vm0, %v4844_v59, 0 }
 0x48e   : > { %3772 = vmatprep.subr.mxu0 %v3380_v58  ;;  %v6277_v58 = vld [vmem:[%s7140_s10] sm:$0xf]  ;;  %v4921_v61 = vand.u32 4294901760, %v4846_v60 }
 0x490   : > { %v4922_v62 = vsub.f32 %v4846_v60, %v4921_v61 }
 0x492   : > { %v4923_v63 = vand.u32 4294901760, %v4922_v62 }
 0x494   : > { %3765 = vmatmul.mubr.f32.vlgmr.msra.gmra.mrb[2].mxu0 %v3447_v46  ;;  %v4924_v5 = vsub.f32 %v4922_v62, %v4923_v63 }
 0x495   : > { %3774 = vmatpush1.msra.mxu0 %v3382_v52  ;;  %3837 = vmatprep.mubr.f32.mxu0 %v6704_v0 }
 0x496   : > { %3853 = vmatprep.subr.mxu0 %v3852_v7 }
 0x49c   : > { %3839 = vmatmul.mubr.f32.vlgmr.msra.gmra.mrb[2].mxu0 %v3447_v46  ;;  %v4405_v46 = vsub.f32 %v4403_v40, %v4404_v43 }
 0x49d   : > { %3855 = vmatpush1.msra.mxu0 %v3854_v12  ;;  %3918 = vmatprep.mubr.f32.mxu0 %v6704_v0 }
 0x49e   : > { %3935 = vmatprep.subr.mxu0 %v3934_v19  ;;  %v4406_v48 = vand.u32 4294901760, %v4405_v46 }
 0x4a4   : > { %3924 = vmatmul.mubr.f32.vlgmr.msra.gmra.mrb[2].mxu0 %v3923_v22 }
 0x4a5   : > { %3941 = vmatpush1.msra.mxu0 %v3940_v23  ;;  %4004 = vmatprep.mubr.f32.mxu0 %v6704_v0  ;;  %v4843_v23 = vld [vmem:[#allocation2 + $0x4] sm:$0xf] }
 0x4a6   : > { %4014 = vmatprep.subr.mxu0 %v3931_v10  ;;  %v5320_v27 = vsel %vm441_vm0, %v4843_v23, 0 }
 0x4a7   : > { %v7057_v30 = vand.u32 4294901760, %v5320_v27 }
 0x4a9   : > { %v5394_v33 = vsub.f32 %v5320_v27, %v7057_v30 }
 0x4ac   : > { %4006 = vmatmul.mubr.f32.vlgmr.msra.gmra.mrb[2].mxu0 %v3919_v11 }
 0x4ad   : > { %4017 = vmatpush1.msra.mxu0 %v3937_v15  ;;  %4080 = vmatprep.mubr.f32.mxu0 %v6704_v0 }
 0x4ae   : > { %4090 = vmatprep.subr.mxu0 %v3852_v7 }
 0x4b4   : > { %4083 = vmatmul.mubr.f32.vlgmr.msra.gmra.mrb[2].mxu0 %v3920_v14 }
 0x4b5   : > { %4092 = vmatpush1.msra.mxu0 %v3854_v12  ;;  %4155 = vmatprep.mubr.f32.mxu0 %v6704_v0 }
 0x4b6   : > { %4168 = vmatprep.subr.mxu0 %v3932_v13  ;;  %v4925_v13 = vand.u32 4294901760, %v4924_v5 }
 0x4bc   : > { %4159 = vmatmul.mubr.f32.vlgmr.msra.gmra.mrb[2].mxu0 %v3921_v17 }
 0x4bd   : > { %4172 = vmatpush1.msra.mxu0 %v3938_v18  ;;  %4235 = vmatprep.mubr.f32.mxu0 %v6704_v0 }
 0x4be   : > { %4244 = vmatprep.subr.mxu0 %v3852_v7 }
 0x4c4   : > { %4237 = vmatmul.mubr.f32.vlgmr.msra.gmra.mrb[2].mxu0 %v3919_v11 }
 0x4c5   : > { %4246 = vmatpush1.msra.mxu0 %v3854_v12  ;;  %4309 = vmatprep.mubr.f32.mxu0 %v6704_v0 }
 0x4c6   : > { %4336 = vmatprep.subr.mxu0 %v4335_v32 }
 0x4cc   : > { %4311 = vmatmul.mubr.f32.vlgmr.msra.gmra.mrb[2].mxu0 %v3919_v11 }
 0x4cd   : > { %4338 = vmatpush1.msra.mxu0 %v4337_v38  ;;  %4401 = vmatprep.mubr.f32.mxu0 %v6704_v0 }
 0x4ce   : > { %4418 = vmatprep.subr.mxu0 %v4417_v45 }
 0x4d4   : > { %4407 = vmatmul.mubr.f32.vlgmr.msra.gmra.mrb[2].mxu0 %v4406_v48 }
 0x4d5   : > { %4424 = vmatpush1.msra.mxu0 %v4423_v49  ;;  %4487 = vmatprep.mubr.f32.mxu0 %v6704_v0 }
 0x4d6   : > { %4497 = vmatprep.subr.mxu0 %v4414_v36  ;;  %v5395_v36 = vand.u32 4294901760, %v5394_v33 }
 0x4dc   : > { %4489 = vmatmul.mubr.f32.vlgmr.msra.gmra.mrb[2].mxu0 %v4402_v37 }
 0x4dd   : > { %4500 = vmatpush1.msra.mxu0 %v4420_v41  ;;  %4563 = vmatprep.mubr.f32.mxu0 %v6704_v0 }
 0x4de   : > { %4573 = vmatprep.subr.mxu0 %v4335_v32 }
 0x4e4   : > { %4566 = vmatmul.mubr.f32.vlgmr.msra.gmra.mrb[2].mxu0 %v4403_v40 }
 0x4e5   : > { %4575 = vmatpush1.msra.mxu0 %v4337_v38  ;;  %4638 = vmatprep.mubr.f32.mxu0 %v6704_v0 }
 0x4e6   : > { %4651 = vmatprep.subr.mxu0 %v4415_v39  ;;  %v5396_v39 = vsub.f32 %v5394_v33, %v5395_v36 }
 0x4e8   : > { %v5397_v41 = vand.u32 4294901760, %v5396_v39 }
 0x4ec   : > { %4642 = vmatmul.mubr.f32.vlgmr.msra.gmra.mrb[2].mxu0 %v4404_v43 }
 0x4ed   : > { %4655 = vmatpush1.msra.mxu0 %v4421_v44  ;;  %4718 = vmatprep.mubr.f32.mxu0 %v6704_v0 }
 0x4ee   : > { %4727 = vmatprep.subr.mxu0 %v4335_v32 }
 0x4f4   : > { %4720 = vmatmul.mubr.f32.vlgmr.msra.gmra.mrb[2].mxu0 %v4402_v37 }
 0x4f5   : > { %4729 = vmatpush1.msra.mxu0 %v4337_v38  ;;  %4792 = vmatprep.mubr.f32.mxu0 %v6704_v0 }
 0x4fc   : > { %4794 = vmatmul.mubr.f32.vlgmr.msra.gmra.mrb[2].mxu0 %v4402_v37 }
 0x5cf   : > { %v4795_v51 = vpop.f32.mrb[2].mxu0 }
 0x5d0   : > { %v4808_v52 = vadd.f32 %v4806_v50, %v4795_v51  ;;  %v4797_v53 = vpop.f32.mrb[3].mxu0 }
 0x5d1   : > { %v4809_v54 = vadd.f32 %v4806_v50, %v4797_v53  ;;  %v5792_v50 = vld [vmem:[#allocation2 + $0x8] sm:$0xf] }
 0x5d2   : > { %v7033_v55 = vmax.f32 %v4808_v52, 0.0  ;;  %v5794_v25 = vsel %vm441_vm0, %v5792_v50, 0 }
 0x5d3   : > { %v4811_v56 = vmax.f32 %v4809_v54, 0.0 }
 0x5d4   : > { %4816 = vrot.lane.b32.xlu0 %v7033_v55, %s6712_s14  ;;  %v5322_v28 = vsel %vm445_vm2, %v7033_v55, 0 }
 0x5d5   : > { %4818 = vrot.lane.b32.xlu1 %v4811_v56, %s6712_s14  ;;  %v5324_v22 = vsel %vm445_vm2, %v4811_v56, 0  ;;  %v5328_v31 = vand.u32 4294901760, %v5322_v28  ;;  %s6310_s14 = sshll.u32 %s394_s30, 4  ;;  %s7090_s14 = int_to_ptr.vmem [resolvable:$true] %s6310_s14 }
 0x5d6   : > { %v5326_v26 = vand.u32 4294901760, %v5324_v22  ;;  %s6633_s26 = scalar_lea.vmem %s7090_s14, 128  ;;  %p6640_p2 = scmp.lt.s32.totalorder %s7090_s14, %s6638_s13 }
 0x5d7   : > { %v5411_v34 = vsub.f32 %v5322_v28, %v5328_v31  ;;  %p6634_p6 = scmp.ne.s32.totalorder %s7090_s14, %s6633_s26  ;;  %p6641_p3 = scmp.lt.s32.totalorder %s6639_s16, %s6633_s26 }
 0x5d8   : > { %4831 = vrot.lane.b32.xlu0 %v4811_v56, %s6713_s15  ;;  %v5405_v29 = vsub.f32 %v5324_v22, %v5326_v26 }
 0x5d9   : > { %4833 = vrot.lane.b32.xlu1 %v6704_v0, %s6713_s15  ;;  %v5412_v37 = vand.u32 4294901760, %v5411_v34  ;;  %p6635_p10 = pnand %p6634_p6, %p7153_p9  ;;  %p6642_p4 = por %p6641_p3, %p6640_p2 }
 0x5da   : > { %v5406_v32 = vand.u32 4294901760, %v5405_v29 }
 0x5db   : > { %v5413_v40 = vsub.f32 %v5411_v34, %v5412_v37  ;;  %p6636_p12 = pneg %p6635_p10 }
 0x5dc   : > { %4829 = vrot.lane.b32.xlu0 %v7033_v55, %s6713_s15  ;;  %v5407_v35 = vsub.f32 %v5405_v29, %v5406_v32  ;;  %v5869_v55 = vand.u32 4294901760, %v5794_v25 }
 0x5dd   : > { %6272 = vperm.xlu1 %6601, %v6269_v57   ;;  %v5414_v42 = vand.u32 4294901760, %v5413_v40  ;;  %p6643_p7 = pnand %p6642_p4, %p6636_p12 }
 0x5de   : > { %v5408_v38 = vand.u32 4294901760, %v5407_v35  ;;  %v5870_v24 = vsub.f32 %v5794_v25, %v5869_v55 }
 0x5e0   : > { %6280 = vperm.xlu0 %6602, %v6277_v58   ;;  %v5871_v60 = vand.u32 4294901760, %v5870_v24 }
 0x646   : > { %v4817_v1 = vpop.permute.xlu0 %4816 }
 0x647   : > { %v4824_v3 = vsel %vm4820_vm12, 0.0, %v4817_v1  ;;  %v4819_v4 = vpop.permute.xlu1 %4818 }
 0x648   : > { %v4825_v6 = vsel %vm4812_vm13, %v4824_v3, 0.0  ;;  %v4821_v7 = vsel %vm4820_vm12, %v4817_v1, %v4819_v4 }
 0x649   : > { %v4849_v8 = vsel %vm445_vm2, %v4825_v6, 0  ;;  %v4826_v9 = vsel %vm4813_vm14, %v4821_v7, 0.0 }
 0x64a   : > { %v4856_v10 = vand.u32 4294901760, %v4849_v8  ;;  %v4852_v11 = vsel %vm445_vm2, %v4826_v9, 0  ;;  %v4832_v43 = vpop.permute.xlu0 %4831 }
 0x64b   : > { %v4854_v12 = vand.u32 4294901760, %v4852_v11  ;;  %v4834_v44 = vpop.permute.xlu1 %4833 }
 0x64c   : > { %v4939_v14 = vsub.f32 %v4849_v8, %v4856_v10  ;;  %v4837_v45 = vsel %vm4835_vm15, %v4832_v43, %v4834_v44 }
 0x64d   : > { %v4933_v15 = vsub.f32 %v4852_v11, %v4854_v12  ;;  %4855 = vmatprep.subr.mxu1 %v4854_v12  ;;  %v4841_v46 = vsel %vm4828_vm1, %v4837_v45, 0.0 }
 0x64e   : > { %v4940_v16 = vand.u32 4294901760, %v4939_v14  ;;  %4857 = vmatpush1.msra.mxu1 %v4856_v10  ;;  %v4830_v47 = vpop.permute.xlu0 %4829  ;;  %v5800_v48 = vsel %vm445_vm2, %v4841_v46, 0 }
 0x64f   : > { %4926 = vmatmul.mubr.f32.vlgmr.msra.gmra.mrb[2].mxu1 %v4925_v13  ;;  %v4934_v17 = vand.u32 4294901760, %v4933_v15  ;;  %v4836_v49 = vsel %vm4835_vm15, %v4830_v47, %v4832_v43  ;;  %v5802_v51 = vand.u32 4294901760, %v5800_v48  ;;  %v6604_v13 = vld [vmem:[%s6865_s29] sm:$0xff]  ;;  %s6296_s29 = scalar_lea.sflag [#allocation4], %s392_s12 }
 0x650   : > { %v4941_v18 = vsub.f32 %v4939_v14, %v4940_v16  ;;  %5006 = vmatprep.mubr.f32.mxu1 %v6704_v0  ;;  %v4840_v52 = vsel %vm4827_vm3, %v4836_v49, 0.0 }
 0x651   : > { %v4935_v19 = vsub.f32 %v4933_v15, %v4934_v17  ;;  %v5881_v53 = vsub.f32 %v5800_v48, %v5802_v51  ;;  %v5797_v54 = vsel %vm445_vm2, %v4840_v52, 0 }
 0x652   : > { %v4942_v21 = vand.u32 4294901760, %v4941_v18  ;;  %v5804_v56 = vand.u32 4294901760, %v5797_v54 }
 0x653   : > { %v4936_v20 = vand.u32 4294901760, %v4935_v19  ;;  %v5882_v57 = vand.u32 4294901760, %v5881_v53 }
 0x654   : > { %v5887_v58 = vsub.f32 %v5797_v54, %v5804_v56 }
 0x655   : > { %4937 = vmatprep.subr.mxu1 %v4936_v20  ;;  %v5883_v59 = vsub.f32 %v5881_v53, %v5882_v57 }
 0x656   : > { %4943 = vmatpush1.msra.mxu1 %v4942_v21 }
 0x657   : > { %5008 = vmatmul.mubr.f32.vlgmr.msra.gmra.mrb[2].mxu1 %v4921_v61  ;;  %5016 = vmatprep.subr.mxu1 %v4933_v15 }
 0x658   : > { %5019 = vmatpush1.msra.mxu1 %v4939_v14  ;;  %5082 = vmatprep.mubr.f32.mxu1 %v6704_v0 }
 0x659   : > { %5092 = vmatprep.subr.mxu1 %v4854_v12 }
 0x65c   : > { %v6273_v5 = vpop.permute.xlu1 %6272 }
 0x65f   : > { %5085 = vmatmul.mubr.f32.vlgmr.msra.gmra.mrb[2].mxu1 %v4922_v62  ;;  %v5884_v62 = vand.u32 4294901760, %v5883_v59  ;;  %v6281_v9 = vpop.permute.xlu0 %6280 }
 0x660   : > { %5094 = vmatpush1.msra.mxu1 %v4856_v10  ;;  %5157 = vmatprep.mubr.f32.mxu1 %v6704_v0 }
 0x661   : > { %5170 = vmatprep.subr.mxu1 %v4934_v17 }
 0x667   : > { %5161 = vmatmul.mubr.f32.vlgmr.msra.gmra.mrb[2].mxu1 %v4923_v63  ;;  %v5872_v63 = vsub.f32 %v5870_v24, %v5871_v60 }
 0x668   : > { %5174 = vmatpush1.msra.mxu1 %v4940_v16  ;;  %5237 = vmatprep.mubr.f32.mxu1 %v6704_v0 }
 0x669   : > { %5246 = vmatprep.subr.mxu1 %v4854_v12  ;;  %v5873_v3 = vand.u32 4294901760, %v5872_v63 }
 0x66f   : > { %5239 = vmatmul.mubr.f32.vlgmr.msra.gmra.mrb[2].mxu1 %v4921_v61 }
 0x670   : > { %5248 = vmatpush1.msra.mxu1 %v4856_v10  ;;  %5311 = vmatprep.mubr.f32.mxu1 %v6704_v0 }
 0x671   : > { %5327 = vmatprep.subr.mxu1 %v5326_v26 }
 0x677   : > { %5313 = vmatmul.mubr.f32.vlgmr.msra.gmra.mrb[2].mxu1 %v4921_v61  ;;  %v5888_v61 = vand.u32 4294901760, %v5887_v58 }
 0x678   : > { %5329 = vmatpush1.msra.mxu1 %v5328_v31  ;;  %5392 = vmatprep.mubr.f32.mxu1 %v6704_v0 }
 0x679   : > { %5409 = vmatprep.subr.mxu1 %v5408_v38  ;;  %v5889_v1 = vsub.f32 %v5887_v58, %v5888_v61 }
 0x67b   : > { %v5890_v4 = vand.u32 4294901760, %v5889_v1 }
 0x67f   : > { %5398 = vmatmul.mubr.f32.vlgmr.msra.gmra.mrb[2].mxu1 %v5397_v41 }
 0x680   : > { %5415 = vmatpush1.msra.mxu1 %v5414_v42  ;;  %5478 = vmatprep.mubr.f32.mxu1 %v6704_v0 }
 0x681   : > { %5488 = vmatprep.subr.mxu1 %v5405_v29 }
 0x687   : > { %5480 = vmatmul.mubr.f32.vlgmr.msra.gmra.mrb[2].mxu1 %v7057_v30 }
 0x688   : > { %5491 = vmatpush1.msra.mxu1 %v5411_v34  ;;  %5554 = vmatprep.mubr.f32.mxu1 %v6704_v0 }
 0x689   : > { %5564 = vmatprep.subr.mxu1 %v5326_v26 }
 0x68f   : > { %5557 = vmatmul.mubr.f32.vlgmr.msra.gmra.mrb[2].mxu1 %v5394_v33 }
 0x690   : > { %5566 = vmatpush1.msra.mxu1 %v5328_v31  ;;  %5629 = vmatprep.mubr.f32.mxu1 %v6704_v0 }
 0x691   : > { %5642 = vmatprep.subr.mxu1 %v5406_v32 }
 0x697   : > { %5633 = vmatmul.mubr.f32.vlgmr.msra.gmra.mrb[2].mxu1 %v5395_v36 }
 0x698   : > { %5646 = vmatpush1.msra.mxu1 %v5412_v37  ;;  %5709 = vmatprep.mubr.f32.mxu1 %v6704_v0 }
 0x699   : > { %5718 = vmatprep.subr.mxu1 %v5326_v26 }
 0x69f   : > { %5711 = vmatmul.mubr.f32.vlgmr.msra.gmra.mrb[2].mxu1 %v7057_v30 }
 0x6a0   : > { %5720 = vmatpush1.msra.mxu1 %v5328_v31  ;;  %5783 = vmatprep.mubr.f32.mxu1 %v6704_v0 }
 0x6a1   : > { %5803 = vmatprep.subr.mxu1 %v5802_v51 }
 0x6a7   : > { %5785 = vmatmul.mubr.f32.vlgmr.msra.gmra.mrb[2].mxu1 %v7057_v30 }
 0x6a8   : > { %5805 = vmatpush1.msra.mxu1 %v5804_v56  ;;  %5868 = vmatprep.mubr.f32.mxu1 %v6704_v0 }
 0x6a9   : > { %5885 = vmatprep.subr.mxu1 %v5884_v62 }
 0x6af   : > { %5874 = vmatmul.mubr.f32.vlgmr.msra.gmra.mrb[2].mxu1 %v5873_v3 }
 0x6b0   : > { %5891 = vmatpush1.msra.mxu1 %v5890_v4  ;;  %5954 = vmatprep.mubr.f32.mxu1 %v6704_v0 }
 0x6b1   : > { %5964 = vmatprep.subr.mxu1 %v5881_v53 }
 0x6b7   : > { %5956 = vmatmul.mubr.f32.vlgmr.msra.gmra.mrb[2].mxu1 %v5869_v55 }
 0x6b8   : > { %5967 = vmatpush1.msra.mxu1 %v5887_v58  ;;  %6030 = vmatprep.mubr.f32.mxu1 %v6704_v0 }
 0x6b9   : > { %6040 = vmatprep.subr.mxu1 %v5802_v51 }
 0x6bf   : > { %6033 = vmatmul.mubr.f32.vlgmr.msra.gmra.mrb[2].mxu1 %v5870_v24 }
 0x6c0   : > { %6042 = vmatpush1.msra.mxu1 %v5804_v56  ;;  %6105 = vmatprep.mubr.f32.mxu1 %v6704_v0 }
 0x6c1   : > { %6118 = vmatprep.subr.mxu1 %v5882_v57 }
 0x6c7   : > { %6109 = vmatmul.mubr.f32.vlgmr.msra.gmra.mrb[2].mxu1 %v5871_v60 }
 0x6c8   : > { %6122 = vmatpush1.msra.mxu1 %v5888_v61  ;;  %6185 = vmatprep.mubr.f32.mxu1 %v6704_v0 }
 0x6c9   : > { %6194 = vmatprep.subr.mxu1 %v5802_v51 }
 0x6cf   : > { %6187 = vmatmul.mubr.f32.vlgmr.msra.gmra.mrb[2].mxu1 %v5869_v55 }
 0x6d0   : > { %6196 = vmatpush1.msra.mxu1 %v5804_v56  ;;  %6259 = vmatprep.mubr.f32.mxu1 %v6704_v0 }
 0x6d7   : > { %6261 = vmatmul.mubr.f32.vlgmr.msra.gmra.mrb[2].mxu1 %v5869_v55 }
 0x7aa   : > { %v6262_v6 = vpop.f32.mrb[2].mxu1 }
 0x7ab   : > { %v6275_v7 = vmul.f32 %v6273_v5, %v6262_v6  ;;  %v6264_v8 = vpop.f32.mrb[3].mxu1 }
 0x7ac   : > { %v6276_v10 = vmul.f32 %v6273_v5, %v6264_v8 }
 0x7ad   : > { %v6283_v11 = vadd.f32 %v6281_v9, %v6275_v7 }
 0x7ae   : > { %v6284_v12 = vadd.f32 %v6281_v9, %v6276_v10 }
 0x7af   : > { %v6286_v14 = vadd.f32 %v6604_v13, %v6283_v11 }
 0x7b0   : > { %v6287_v15 = vadd.f32 %v6284_v12, %v6873_v2 }
 0x7b1   : > { %v6288_v16 = vmax.f32 %v6286_v14, 0.0 }
 0x7b2   : > { %v6289_v0 = vmax.f32 %v6287_v15, 0.0 }
 0x7b4   : > { %v6292_v17 = vcombine.low %v6288_v16, %v6289_v0 }
 0x7b6   : > { %6294 = vst [vmem:[%s394_s30] sm:$0xff] %v6292_v17 }
 0x7b7   : > { %6646 = shalt.err (!%p6643_p7)
}
 0x7b8   : > { %s6647_s12 = scalar_lea.hbm %s7088_s24, 128  ;;  %s6651_s15 = scalar_lea.hbm %s7141_s11, 256 }
 0x7b9   : > { %p6648_p8 = scmp.ne.s32.totalorder %s7088_s24, %s6647_s12  ;;  %p6652_p1 = scmp.lt.u32.totalorder %s7088_s24, %s7141_s11 }
 0x7ba   : > { %p6653_p0 = scmp.lt.u32.totalorder %s6651_s15, %s6647_s12  ;;  %p6655_p6 = scmp.lt.u32.totalorder %s6647_s12, %s7088_s24 }
 0x7bb   : > { %p6649_p11 = pnand %p6648_p8, %p7153_p9 }
 0x7bc   : > { %p6654_p5 = por %p6653_p0, %p6652_p1 }
 0x7bd   : > { %p6650_p13 = pneg %p6649_p11 }
 0x7be   : > { %p6656_p10 = por %p6655_p6, %p6654_p5 }
 0x7c0   : > { %p6657_p12 = pnand %p6656_p10, %p6650_p13 }
 0x7c2   : > { %6660 = shalt.err (!%p6657_p12)
}
 0x7c3   : > { %6543 = dma.vmem_to_hbm [thread:$0]  (%p7153_p9), %s7090_s14, 128, %s7088_s24, %s6296_s29  }
 0x7c4 PF: > { %p6555_p2 = scmp.ge.s32.totalorder %s6699_s20, 2  ;;  %s6322_s26 = sand.u32 1, %s6687_s17  }
 0x7c5   : > { %p7154_p3 = scmp.ne.s32.totalorder %s7147_s28, 0  ;;  %s6323_s13 = scalar_lea.sflag [#allocation4], %s6322_s26 }
 0x7c7   : > { %p6550_p4 = pnand %p6555_p2, %p7154_p3 }
 0x7c9   : > { %6682 = dma.done.wait (!%p6550_p4), %s6323_s13, 128  }
 0x7ca   : > { %6684 = vsyncadd (!%p6550_p4), %s6323_s13, 4294967168  ;;  %s7155_s16 = sld [smem:[#allocation8_spill]]  ;;  %p22_p7 = scmp.ge.s32.totalorder %s6800_s23, 4  }
 0x7cb   : > { %s7156_s17 = smov %s6691_s18  ;;  %s7157_s18 = smov %s6695_s19 }
 0x7cc   : > { %s7159_s20 = smov %s6800_s23  ;;  %24 = sbr.rel (!%p22_p7) target bundleno = 4 (0x4), region = 112 }
 0x7d0   : > { %s7158_s19 = smov %s7155_s16 }
 0x7d3   :  { %6328 = vsyncpa [#allocation3], 1 }
 0x7d4   :  { %6330 = vsyncpa [#allocation3 + $0x1], 1 }
 0x7d5   :  { %6331 = vsyncpa [#allocation4], 1 }
 0x7d6   :  { %6333 = vsyncpa [#allocation4 + $0x1], 1 }

</bundles_post_ra>
